<compile_context>
chip_gen: v7x
topology: tpu7x:2x2x1
jax: 0.10.0
libtpu: 0.0.40
codegen_flags: <defaults>
</compile_context>

<pallas_src>
import functools
import numpy as np
import jax
import jax.numpy as jnp
from jax.experimental import pallas as pl
from jax.experimental.pallas import tpu as pltpu

HIGHEST = jax.lax.Precision.HIGHEST


# ----------------------------------------------------------------------------
# Pallas kernel: one grid step == Nb images.
# ----------------------------------------------------------------------------
def _feature_loss_kernel(temp, C, HW,
                         s_ref, t_ref, mfg_ref, mbg_ref,
                         wms_ref, wmt_ref,
                         w1sT_ref, w2sT_ref, w1tT_ref, w2tT_ref,
                         out_ref):
    s = s_ref[...]          # (Nb, C, HW)  student features
    t = t_ref[...]          # (Nb, C, HW)  teacher features
    mfg = mfg_ref[...]      # (Nb, 1, HW)  foreground mask
    mbg = mbg_ref[...]      # (Nb, 1, HW)  background mask
    nb = s.shape[0]

    inv_temp = 1.0 / temp

    def attention(v):       # v = |x|, (Nb, C, HW)
        # spatial attention: H*W * softmax over spatial of channel-mean / temp
        fea = jnp.mean(v, axis=1, keepdims=True) * inv_temp           # (Nb, 1, HW)
        fea = fea - jnp.max(fea, axis=2, keepdims=True)
        e = jnp.exp(fea)
        s_att = (float(HW) * e) * pl.reciprocal(
            jnp.sum(e, axis=2, keepdims=True), approx=True)           # (Nb, 1, HW)
        # channel attention: C * softmax over channels of spatial-mean / temp
        ch = jnp.mean(v, axis=2, keepdims=True) * inv_temp            # (Nb, C, 1)
        ch = ch - jnp.max(ch, axis=1, keepdims=True)
        ec = jnp.exp(ch)
        c_att = (float(C) * ec) * pl.reciprocal(
            jnp.sum(ec, axis=1, keepdims=True), approx=True)          # (Nb, C, 1)
        return s_att, c_att

    s_att_t, c_att_t = attention(jnp.abs(t))
    s_att_s, c_att_s = attention(jnp.abs(s))

    # ---- mask (attention) L1 loss partial sums ------------------------------
    mc = jnp.sum(jnp.abs(c_att_s - c_att_t))
    ms = jnp.sum(jnp.abs(s_att_s - s_att_t))

    # ---- fused fg / bg masked-MSE: reduce over C BEFORE the spatial masks ---
    # (s-t)^2 * C_t * S_t * M == [sum_c (s-t)^2 * C_t] * S_t * M
    d = s - t                                                         # (Nb, C, HW)
    dd = d * d
    wdd = jnp.sum(dd * c_att_t, axis=1, keepdims=True)                # (Nb, 1, HW)
    wdds = wdd * s_att_t                                              # (Nb, 1, HW)
    fg_sq = jnp.sum(wdds * mfg)
    bg_sq = jnp.sum(wdds * mbg)

    # ---- global context pooling + channel-add (relation loss) ---------------
    def spatial_pool(x, wm):              # wm: (1, C) lane-dense 1x1 conv C->1
        # conv_mask logits on the MXU (batched matvec, flash-style dot pattern)
        wb = jnp.broadcast_to(wm.reshape(1, 1, C), (nb, 1, C))        # (Nb, 1, C)
        cm = jnp.einsum('noc,nck->nok', wb, x, precision=HIGHEST,
                        preferred_element_type=jnp.float32)           # (Nb, 1, HW)
        cm = cm - jnp.max(cm, axis=2, keepdims=True)
        e = jnp.exp(cm)
        p = e * pl.reciprocal(jnp.sum(e, axis=2, keepdims=True), approx=True)
        return jnp.sum(x * p, axis=2)                                 # (Nb, C)

    def channel_add(ctx, w1T, w2T):       # ctx (Nb,C), w1T (C,C//2), w2T (C//2,C)
        y = jnp.dot(ctx, w1T, precision=HIGHEST,
                    preferred_element_type=jnp.float32)               # (Nb, C//2)
        mu = jnp.mean(y, axis=1, keepdims=True)
        var = jnp.mean((y - mu) ** 2, axis=1, keepdims=True)
        y = jnp.maximum((y - mu) * jax.lax.rsqrt(var + 1e-5), 0.0)    # LN + ReLU
        return jnp.dot(y, w2T, precision=HIGHEST,
                       preferred_element_type=jnp.float32)            # (Nb, C)

    ctx_s = spatial_pool(s, wms_ref[...])
    ctx_t = spatial_pool(t, wmt_ref[...])
    add_d = (channel_add(ctx_s, w1sT_ref[...], w2sT_ref[...])
             - channel_add(ctx_t, w1tT_ref[...], w2tT_ref[...]))      # (Nb, C)

    # sum((d + a)^2) = sum(d^2) + 2*sum(a * sum_hw d) + HW * sum(a^2)
    d_sum = jnp.sum(d, axis=2)                                        # (Nb, C)
    rela_sq = (jnp.sum(dd)
               + 2.0 * jnp.sum(add_d * d_sum)
               + float(HW) * jnp.sum(add_d * add_d))

    # ---- single consolidated output tile: lanes 0..4 of sublane row 0 -------
    lane = jax.lax.broadcasted_iota(jnp.int32, out_ref.shape, 2)
    tile = (jnp.where(lane == 0, fg_sq, 0.0)
            + jnp.where(lane == 1, bg_sq, 0.0)
            + jnp.where(lane == 2, mc, 0.0)
            + jnp.where(lane == 3, ms, 0.0)
            + jnp.where(lane == 4, rela_sq, 0.0))
    out_ref[...] = tile.astype(out_ref.dtype)


# ----------------------------------------------------------------------------
# Device-aware VMEM budget and block-batch picker.
# ----------------------------------------------------------------------------
def _vmem_limit_bytes():
    cap = 128 * 1024 * 1024
    try:
        cap = int(pltpu.get_tpu_info().vmem_capacity_bytes)
    except Exception:
        pass  # fall back to 128 MiB (v5e/v6e physical)
    # ~3/4 of physical, capped at 96 MiB  ->  ~96 MiB on 128-MiB parts, ~48 MiB on v7x.
    return int(min(cap * 3 // 4, 96 * 1024 * 1024))


def _pick_block_batch(N, C, HW, vmem_limit):
    # ~(2x double-buffered s/t blocks + live f32 temporaries) per image,
    # plus double-buffered masks; weights + output tiles reserved separately.
    per_image = 12 * C * HW * 4 + 4 * HW * 4
    C2 = max(C // 2, 1)
    weights = 2 * 2 * (2 * C + 4 * C * C2) * 4 + 2 * 8 * 128 * 4
    budget = max(vmem_limit - weights, per_image)
    nb = max(1, min(N, int(budget // per_image)))
    # keep >= 2 (ideally >= 4) grid steps: pipeline overlap + megacore on 2-TC parts.
    target_blocks = 4 if N >= 4 else (2 if N >= 2 else 1)
    nb = min(nb, -(-N // target_blocks))
    return max(1, int(nb))


# ----------------------------------------------------------------------------
# Wrapper: glue + pallas_call
# ----------------------------------------------------------------------------
def feature_loss_pallas(preds_s, preds_t, mask_fg, mask_bg, params,
                        temp=0.5, alpha_fgd=0.001, beta_fgd=0.0005,
                        gamma_fgd=0.001, lambda_fgd=5e-6):
    N, C, H, W = preds_s.shape
    HW = H * W
    s = preds_s.reshape(N, C, HW).astype(jnp.float32)
    t = preds_t.reshape(N, C, HW).astype(jnp.float32)
    mfg = mask_fg.reshape(N, 1, HW).astype(jnp.float32)
    mbg = mask_bg.reshape(N, 1, HW).astype(jnp.float32)

    # lane-dense 1x1 mask-conv weights (1, C); pre-transposed channel-add weights.
    wmsT = params["w_mask_s"].reshape(1, C)
    wmtT = params["w_mask_t"].reshape(1, C)
    w1sT = jnp.transpose(params["w1_s"])        # (C, C//2)
    w2sT = jnp.transpose(params["w2_s"])        # (C//2, C)
    w1tT = jnp.transpose(params["w1_t"])
    w2tT = jnp.transpose(params["w2_t"])

    vmem_limit = _vmem_limit_bytes()
    nb = _pick_block_batch(N, C, HW, vmem_limit)
    n_blocks = -(-N // nb)
    n_pad = n_blocks * nb
    if n_pad != N:
        # zero-padded images contribute exactly 0 to all five partial sums
        # (d=0, masks=0, add_d=0, identical attentions); divide by original N below.
        pad = ((0, n_pad - N), (0, 0), (0, 0))
        s, t = jnp.pad(s, pad), jnp.pad(t, pad)
        mfg, mbg = jnp.pad(mfg, pad), jnp.pad(mbg, pad)

    kernel = functools.partial(_feature_loss_kernel, float(temp), C, HW)

    # TODO(synk): for very large H*W (e.g. 80x80 at C=256) add an HW-tiling grid axis
    #             with a two-pass / online spatial softmax; whole-HW blocks are fine here.
    feat_spec = pl.BlockSpec((nb, C, HW), lambda b: (b, 0, 0))
    mask_spec = pl.BlockSpec((nb, 1, HW), lambda b: (b, 0, 0))
    wm_spec = pl.BlockSpec((1, C), lambda b: (0, 0))
    w1T_spec = pl.BlockSpec((C, C // 2), lambda b: (0, 0))
    w2T_spec = pl.BlockSpec((C // 2, C), lambda b: (0, 0))
    out_spec = pl.BlockSpec((1, 8, 128), lambda b: (b, 0, 0))

    outs = pl.pallas_call(
        kernel,
        out_shape=jax.ShapeDtypeStruct((n_blocks, 8, 128), jnp.float32),
        grid_spec=pltpu.PrefetchScalarGridSpec(
            num_scalar_prefetch=0,
            grid=(n_blocks,),
            in_specs=[feat_spec, feat_spec, mask_spec, mask_spec,
                      wm_spec, wm_spec,
                      w1T_spec, w2T_spec, w1T_spec, w2T_spec],
            out_specs=out_spec,
        ),
        compiler_params=pltpu.CompilerParams(
            dimension_semantics=("parallel",),
            vmem_limit_bytes=vmem_limit,
        ),
    )(s, t, mfg, mbg, wmsT, wmtT, w1sT, w2sT, w1tT, w2tT)

    partial_sums = jnp.sum(outs[:, 0, :5], axis=0)   # [fg, bg, mc, ms, rela]
    fg_loss = partial_sums[0] / N
    bg_loss = partial_sums[1] / N
    mask_loss = (partial_sums[2] + partial_sums[3]) / N
    rela_loss = partial_sums[4] / N
    return (alpha_fgd * fg_loss + beta_fgd * bg_loss
            + gamma_fgd * mask_loss + lambda_fgd * rela_loss)


# ----------------------------------------------------------------------------
# Glue: gt_box -> (batch selection, Mask_fg, Mask_bg).  Mirrors the PyTorch
# forward's box handling (including its unusual wmax/hmax formula).
# TODO(synk): box rasterization is dynamic (data-dependent box count) and is
#             done eagerly in NumPy rather than inside the Pallas kernel.
# ----------------------------------------------------------------------------
def build_masks_and_select(gt_box, H, W):
    gt_box = np.asarray(gt_box, np.float32)
    batch_ind = np.unique(gt_box[:, 0])
    masks_fg, masks_bg = [], []
    for ind in batch_ind:
        boxes = gt_box[gt_box[:, 0] == ind, 2:]
        wmin = np.floor((boxes[:, 0] - boxes[:, 2] / 2) * W).astype(np.int32)
        wmax = np.ceil((boxes[:, 2] + boxes[:, 2] / 2) * W).astype(np.int32)
        hmin = np.floor((boxes[:, 1] - boxes[:, 3] / 2) * H).astype(np.int32)
        hmax = np.ceil((boxes[:, 3] + boxes[:, 3] / 2) * H).astype(np.int32)
        area = 1.0 / (hmax + 1 - hmin) / (wmax + 1 - wmin)
        mfg = np.zeros((H, W), np.float32)
        for j in range(len(boxes)):
            mfg[hmin[j]:hmax[j] + 1, wmin[j]:wmax[j] + 1] = np.maximum(
                mfg[hmin[j]:hmax[j] + 1, wmin[j]:wmax[j] + 1], area[j])
        mbg = np.where(mfg > 0, 0.0, 1.0).astype(np.float32)
        if mbg.sum():
            mbg = mbg / mbg.sum()
        masks_fg.append(mfg)
        masks_bg.append(mbg)
    return batch_ind.astype(np.int32), np.stack(masks_fg), np.stack(masks_bg)


# ----------------------------------------------------------------------------
# Deterministic parameter init (matches module __init__ shapes; kaiming fan_out).
# student_channels == teacher_channels, so self.align is None.
# ----------------------------------------------------------------------------
def init_params(key, C):
    C2 = C // 2
    ks = jax.random.split(key, 6)

    def kaiming(k, shape, fan_out):
        return (jnp.sqrt(2.0 / fan_out) *
                jax.random.normal(k, shape)).astype(jnp.float32)

    return {
        # conv_mask_{s,t}: Conv2d(C, 1, 1, bias=False); weight (1,C,1,1) -> (C,1)
        "w_mask_s": kaiming(ks[0], (C, 1), 1.0),
        "w_mask_t": kaiming(ks[1], (C, 1), 1.0),
        # channel_add_conv_{s,t}[0]: Conv2d(C, C//2, 1, bias=False) -> (C//2, C)
        "w1_s": kaiming(ks[2], (C2, C), C2),
        "w1_t": kaiming(ks[3], (C2, C), C2),
        # channel_add_conv_{s,t}[3]: Conv2d(C//2, C, 1, bias=False) -> (C, C//2)
        "w2_s": kaiming(ks[4], (C, C2), C),
        "w2_t": kaiming(ks[5], (C, C2), C),
    }


# ----------------------------------------------------------------------------
# Pure-JAX reference (mirrors the PyTorch forward) for a correctness check.
# ----------------------------------------------------------------------------
def reference_loss(preds_s, preds_t, mask_fg, mask_bg, params,
                   temp=0.5, alpha_fgd=0.001, beta_fgd=0.0005,
                   gamma_fgd=0.001, lambda_fgd=5e-6):
    N, C, H, W = preds_s.shape

    def attention(x):
        v = jnp.abs(x)
        fea = v.mean(axis=1)
        s_att = (H * W) * jax.nn.softmax((fea / temp).reshape(N, -1), axis=1)
        s_att = s_att.reshape(N, H, W)
        ch = v.mean(axis=(2, 3))
        c_att = C * jax.nn.softmax(ch / temp, axis=1)
        return s_att, c_att

    s_t, c_t = attention(preds_t)
    s_s, c_s = attention(preds_s)
    mask_loss = jnp.sum(jnp.abs(c_s - c_t)) / N + jnp.sum(jnp.abs(s_s - s_t)) / N

    St = jnp.sqrt(s_t[:, None])
    Ct = jnp.sqrt(c_t[:, :, None, None])
    fea_t = preds_t * St * Ct
    fea_s = preds_s * St * Ct
    sfg = jnp.sqrt(mask_fg[:, None])
    sbg = jnp.sqrt(mask_bg[:, None])
    fg_loss = jnp.sum((fea_s * sfg - fea_t * sfg) ** 2) / N
    bg_loss = jnp.sum((fea_s * sbg - fea_t * sbg) ** 2) / N

    def spatial_pool(x, w):               # w: (C, 1)
        xf = x.reshape(N, C, H * W)
        cm = jnp.einsum('nck,c->nk', xf, w[:, 0], precision=HIGHEST)
        p = jax.nn.softmax(cm, axis=1)
        return jnp.einsum('nck,nk->nc', xf, p, precision=HIGHEST)

    def channel_add(ctx, w1, w2):
        y = jnp.matmul(ctx, w1.T, precision=HIGHEST)
        mu = y.mean(axis=1, keepdims=True)
        var = ((y - mu) ** 2).mean(axis=1, keepdims=True)
        y = jax.nn.relu((y - mu) / jnp.sqrt(var + 1e-5))
        return jnp.matmul(y, w2.T, precision=HIGHEST)

    add_s = channel_add(spatial_pool(preds_s, params["w_mask_s"]),
                        params["w1_s"], params["w2_s"])
    add_t = channel_add(spatial_pool(preds_t, params["w_mask_t"]),
                        params["w1_t"], params["w2_t"])
    out_s = preds_s + add_s[:, :, None, None]
    out_t = preds_t + add_t[:, :, None, None]
    rela_loss = jnp.sum((out_s - out_t) ** 2) / N

    return (alpha_fgd * fg_loss + beta_fgd * bg_loss
            + gamma_fgd * mask_loss + lambda_fgd * rela_loss)


if __name__ == "__main__":
    B, C, H, W = 2, 32, 16, 16          # student_channels == teacher_channels == 32
    temp = 0.5

    key = jax.random.PRNGKey(0)
    k1, k2, k3 = jax.random.split(key, 3)
    pred_s = jax.random.normal(k1, (B, C, H, W), jnp.float32)
    pred_t = jax.random.normal(k2, (B, C, H, W), jnp.float32)
    params = init_params(k3, C)

    # gt_box rows: [batch_idx, class, x, y, w, h] (normalized, as in YOLO targets)
    gt_box = np.array([
        [0, 0, 0.50, 0.50, 0.30, 0.30],
        [0, 1, 0.25, 0.30, 0.20, 0.25],
        [1, 0, 0.40, 0.50, 0.30, 0.35],
    ], np.float32)

    batch_ind, mask_fg_np, mask_bg_np = build_masks_and_select(gt_box, H, W)
    sel = jnp.asarray(batch_ind)
    preds_s = pred_s[sel]               # align is None (equal channels)
    preds_t = pred_t[sel]
    mask_fg = jnp.asarray(mask_fg_np)
    mask_bg = jnp.asarray(mask_bg_np)

    loss = feature_loss_pallas(preds_s, preds_t, mask_fg, mask_bg, params, temp=temp)
    loss = jax.block_until_ready(loss)

    ref = reference_loss(preds_s, preds_t, mask_fg, mask_bg, params, temp=temp)
    np.testing.assert_allclose(np.asarray(loss), np.asarray(ref),
                               rtol=5e-3, atol=1e-6)
    print("KERNEL_OK")
</pallas_src>

<mosaic_0001>
module attributes {stable_mosaic.version = 11 : i64} {
  func.func @_feature_loss_kernel(%arg0: i32, %arg1: memref<1x32x256xf32, #tpu.memory_space<vmem>>, %arg2: memref<1x32x256xf32, #tpu.memory_space<vmem>>, %arg3: memref<1x1x256xf32, #tpu.memory_space<vmem>>, %arg4: memref<1x1x256xf32, #tpu.memory_space<vmem>>, %arg5: memref<1x32xf32, #tpu.memory_space<vmem>>, %arg6: memref<1x32xf32, #tpu.memory_space<vmem>>, %arg7: memref<32x16xf32, #tpu.memory_space<vmem>>, %arg8: memref<16x32xf32, #tpu.memory_space<vmem>>, %arg9: memref<32x16xf32, #tpu.memory_space<vmem>>, %arg10: memref<16x32xf32, #tpu.memory_space<vmem>>, %arg11: memref<1x8x128xf32, #tpu.memory_space<vmem>>) attributes {dimension_semantics = [#tpu.dimension_semantics<parallel>], iteration_bounds = array<i64: 2>, scalar_prefetch = 0 : i64, scratch_operands = 0 : i64, tpu.core_type = #tpu.core_type<tc>, window_params = [{transform_indices = @transform_0, window_bounds = array<i64: 1, 32, 256>}, {transform_indices = @transform_1, window_bounds = array<i64: 1, 32, 256>}, {transform_indices = @transform_2, window_bounds = array<i64: 1, 1, 256>}, {transform_indices = @transform_3, window_bounds = array<i64: 1, 1, 256>}, {pipeline_mode = #tpu.pipeline_mode<synchronous>, transform_indices = @transform_4, window_bounds = array<i64: 1, 32>}, {pipeline_mode = #tpu.pipeline_mode<synchronous>, transform_indices = @transform_5, window_bounds = array<i64: 1, 32>}, {pipeline_mode = #tpu.pipeline_mode<synchronous>, transform_indices = @transform_6, window_bounds = array<i64: 32, 16>}, {pipeline_mode = #tpu.pipeline_mode<synchronous>, transform_indices = @transform_7, window_bounds = array<i64: 16, 32>}, {pipeline_mode = #tpu.pipeline_mode<synchronous>, transform_indices = @transform_8, window_bounds = array<i64: 32, 16>}, {pipeline_mode = #tpu.pipeline_mode<synchronous>, transform_indices = @transform_9, window_bounds = array<i64: 16, 32>}, {transform_indices = @transform_10, window_bounds = array<i64: 1, 8, 128>}]} {
    %c0 = arith.constant 0 : index
    %c0_0 = arith.constant 0 : index
    %c0_1 = arith.constant 0 : index
    %0 = vector.load %arg1[%c0, %c0_0, %c0_1] : memref<1x32x256xf32, #tpu.memory_space<vmem>>, vector<1x32x256xf32>
    %c0_2 = arith.constant 0 : index
    %c0_3 = arith.constant 0 : index
    %c0_4 = arith.constant 0 : index
    %1 = vector.load %arg2[%c0_2, %c0_3, %c0_4] : memref<1x32x256xf32, #tpu.memory_space<vmem>>, vector<1x32x256xf32>
    %c0_5 = arith.constant 0 : index
    %c0_6 = arith.constant 0 : index
    %c0_7 = arith.constant 0 : index
    %2 = vector.load %arg3[%c0_5, %c0_6, %c0_7] : memref<1x1x256xf32, #tpu.memory_space<vmem>>, vector<1x1x256xf32>
    %c0_8 = arith.constant 0 : index
    %c0_9 = arith.constant 0 : index
    %c0_10 = arith.constant 0 : index
    %3 = vector.load %arg4[%c0_8, %c0_9, %c0_10] : memref<1x1x256xf32, #tpu.memory_space<vmem>>, vector<1x1x256xf32>
    %4 = math.absf %1 : vector<1x32x256xf32>
    %cst = arith.constant dense<0.000000e+00> : vector<1x256xf32>
    %5 = vector.multi_reduction <add>, %4, %cst [1] : vector<1x32x256xf32> to vector<1x256xf32>
    %6 = vector.shape_cast %5 : vector<1x256xf32> to vector<1x1x256xf32>
    %cst_11 = arith.constant 3.200000e+01 : f32
    %7 = vector.broadcast %cst_11 : f32 to vector<1x1x256xf32>
    %8 = arith.divf %6, %7 : vector<1x1x256xf32>
    %cst_12 = arith.constant 2.000000e+00 : f32
    %9 = vector.broadcast %cst_12 : f32 to vector<1x1x256xf32>
    %10 = arith.mulf %8, %9 : vector<1x1x256xf32>
    %cst_13 = arith.constant dense<0xFF800000> : vector<1x1xf32>
    %11 = vector.multi_reduction <maximumf>, %10, %cst_13 [2] : vector<1x1x256xf32> to vector<1x1xf32>
    %12 = vector.shape_cast %11 : vector<1x1xf32> to vector<1x1x1xf32>
    %13 = vector.broadcast %12 : vector<1x1x1xf32> to vector<1x1x256xf32>
    %14 = arith.subf %10, %13 : vector<1x1x256xf32>
    %15 = math.exp %14 : vector<1x1x256xf32>
    %cst_14 = arith.constant 2.560000e+02 : f32
    %16 = vector.broadcast %cst_14 : f32 to vector<1x1x256xf32>
    %17 = arith.mulf %16, %15 : vector<1x1x256xf32>
    %cst_15 = arith.constant dense<0.000000e+00> : vector<1x1xf32>
    %18 = vector.multi_reduction <add>, %15, %cst_15 [2] : vector<1x1x256xf32> to vector<1x1xf32>
    %19 = vector.shape_cast %18 : vector<1x1xf32> to vector<1x1x1xf32>
    %20 = tpu.reciprocal %19 {approx = true} : vector<1x1x1xf32> -> vector<1x1x1xf32>
    %21 = vector.broadcast %20 : vector<1x1x1xf32> to vector<1x1x256xf32>
    %22 = arith.mulf %17, %21 : vector<1x1x256xf32>
    %cst_16 = arith.constant dense<0.000000e+00> : vector<1x32xf32>
    %23 = vector.multi_reduction <add>, %4, %cst_16 [2] : vector<1x32x256xf32> to vector<1x32xf32>
    %24 = vector.shape_cast %23 : vector<1x32xf32> to vector<1x32x1xf32>
    %cst_17 = arith.constant 2.560000e+02 : f32
    %25 = vector.broadcast %cst_17 : f32 to vector<1x32x1xf32>
    %26 = arith.divf %24, %25 : vector<1x32x1xf32>
    %cst_18 = arith.constant 2.000000e+00 : f32
    %27 = vector.broadcast %cst_18 : f32 to vector<1x32x1xf32>
    %28 = arith.mulf %26, %27 : vector<1x32x1xf32>
    %cst_19 = arith.constant dense<0xFF800000> : vector<1x1xf32>
    %29 = vector.multi_reduction <maximumf>, %28, %cst_19 [1] : vector<1x32x1xf32> to vector<1x1xf32>
    %30 = vector.shape_cast %29 : vector<1x1xf32> to vector<1x1x1xf32>
    %31 = vector.broadcast %30 : vector<1x1x1xf32> to vector<1x32x1xf32>
    %32 = arith.subf %28, %31 : vector<1x32x1xf32>
    %33 = math.exp %32 : vector<1x32x1xf32>
    %cst_20 = arith.constant 3.200000e+01 : f32
    %34 = vector.broadcast %cst_20 : f32 to vector<1x32x1xf32>
    %35 = arith.mulf %34, %33 : vector<1x32x1xf32>
    %cst_21 = arith.constant dense<0.000000e+00> : vector<1x1xf32>
    %36 = vector.multi_reduction <add>, %33, %cst_21 [1] : vector<1x32x1xf32> to vector<1x1xf32>
    %37 = vector.shape_cast %36 : vector<1x1xf32> to vector<1x1x1xf32>
    %38 = tpu.reciprocal %37 {approx = true} : vector<1x1x1xf32> -> vector<1x1x1xf32>
    %39 = vector.broadcast %38 : vector<1x1x1xf32> to vector<1x32x1xf32>
    %40 = arith.mulf %35, %39 : vector<1x32x1xf32>
    %41 = math.absf %0 : vector<1x32x256xf32>
    %cst_22 = arith.constant dense<0.000000e+00> : vector<1x256xf32>
    %42 = vector.multi_reduction <add>, %41, %cst_22 [1] : vector<1x32x256xf32> to vector<1x256xf32>
    %43 = vector.shape_cast %42 : vector<1x256xf32> to vector<1x1x256xf32>
    %cst_23 = arith.constant 3.200000e+01 : f32
    %44 = vector.broadcast %cst_23 : f32 to vector<1x1x256xf32>
    %45 = arith.divf %43, %44 : vector<1x1x256xf32>
    %cst_24 = arith.constant 2.000000e+00 : f32
    %46 = vector.broadcast %cst_24 : f32 to vector<1x1x256xf32>
    %47 = arith.mulf %45, %46 : vector<1x1x256xf32>
    %cst_25 = arith.constant dense<0xFF800000> : vector<1x1xf32>
    %48 = vector.multi_reduction <maximumf>, %47, %cst_25 [2] : vector<1x1x256xf32> to vector<1x1xf32>
    %49 = vector.shape_cast %48 : vector<1x1xf32> to vector<1x1x1xf32>
    %50 = vector.broadcast %49 : vector<1x1x1xf32> to vector<1x1x256xf32>
    %51 = arith.subf %47, %50 : vector<1x1x256xf32>
    %52 = math.exp %51 : vector<1x1x256xf32>
    %cst_26 = arith.constant 2.560000e+02 : f32
    %53 = vector.broadcast %cst_26 : f32 to vector<1x1x256xf32>
    %54 = arith.mulf %53, %52 : vector<1x1x256xf32>
    %cst_27 = arith.constant dense<0.000000e+00> : vector<1x1xf32>
    %55 = vector.multi_reduction <add>, %52, %cst_27 [2] : vector<1x1x256xf32> to vector<1x1xf32>
    %56 = vector.shape_cast %55 : vector<1x1xf32> to vector<1x1x1xf32>
    %57 = tpu.reciprocal %56 {approx = true} : vector<1x1x1xf32> -> vector<1x1x1xf32>
    %58 = vector.broadcast %57 : vector<1x1x1xf32> to vector<1x1x256xf32>
    %59 = arith.mulf %54, %58 : vector<1x1x256xf32>
    %cst_28 = arith.constant dense<0.000000e+00> : vector<1x32xf32>
    %60 = vector.multi_reduction <add>, %41, %cst_28 [2] : vector<1x32x256xf32> to vector<1x32xf32>
    %61 = vector.shape_cast %60 : vector<1x32xf32> to vector<1x32x1xf32>
    %cst_29 = arith.constant 2.560000e+02 : f32
    %62 = vector.broadcast %cst_29 : f32 to vector<1x32x1xf32>
    %63 = arith.divf %61, %62 : vector<1x32x1xf32>
    %cst_30 = arith.constant 2.000000e+00 : f32
    %64 = vector.broadcast %cst_30 : f32 to vector<1x32x1xf32>
    %65 = arith.mulf %63, %64 : vector<1x32x1xf32>
    %cst_31 = arith.constant dense<0xFF800000> : vector<1x1xf32>
    %66 = vector.multi_reduction <maximumf>, %65, %cst_31 [1] : vector<1x32x1xf32> to vector<1x1xf32>
    %67 = vector.shape_cast %66 : vector<1x1xf32> to vector<1x1x1xf32>
    %68 = vector.broadcast %67 : vector<1x1x1xf32> to vector<1x32x1xf32>
    %69 = arith.subf %65, %68 : vector<1x32x1xf32>
    %70 = math.exp %69 : vector<1x32x1xf32>
    %cst_32 = arith.constant 3.200000e+01 : f32
    %71 = vector.broadcast %cst_32 : f32 to vector<1x32x1xf32>
    %72 = arith.mulf %71, %70 : vector<1x32x1xf32>
    %cst_33 = arith.constant dense<0.000000e+00> : vector<1x1xf32>
    %73 = vector.multi_reduction <add>, %70, %cst_33 [1] : vector<1x32x1xf32> to vector<1x1xf32>
    %74 = vector.shape_cast %73 : vector<1x1xf32> to vector<1x1x1xf32>
    %75 = tpu.reciprocal %74 {approx = true} : vector<1x1x1xf32> -> vector<1x1x1xf32>
    %76 = vector.broadcast %75 : vector<1x1x1xf32> to vector<1x32x1xf32>
    %77 = arith.mulf %72, %76 : vector<1x32x1xf32>
    %78 = arith.subf %77, %40 : vector<1x32x1xf32>
    %79 = math.absf %78 : vector<1x32x1xf32>
    %80 = vector.shape_cast %79 : vector<1x32x1xf32> to vector<1x1x32x1xf32>
    %cst_34 = arith.constant dense<0.000000e+00> : vector<1xf32>
    %81 = vector.multi_reduction <add>, %80, %cst_34 [1, 2, 3] : vector<1x1x32x1xf32> to vector<1xf32>
    %82 = vector.shape_cast %81 : vector<1xf32> to vector<1x1x1x1xf32>
    %83 = vector.extract %82[0, 0, 0, 0] : f32 from vector<1x1x1x1xf32>
    %84 = arith.subf %59, %22 : vector<1x1x256xf32>
    %85 = math.absf %84 : vector<1x1x256xf32>
    %86 = vector.shape_cast %85 : vector<1x1x256xf32> to vector<1x1x1x256xf32>
    %cst_35 = arith.constant dense<0.000000e+00> : vector<1xf32>
    %87 = vector.multi_reduction <add>, %86, %cst_35 [1, 2, 3] : vector<1x1x1x256xf32> to vector<1xf32>
    %88 = vector.shape_cast %87 : vector<1xf32> to vector<1x1x1x1xf32>
    %89 = vector.extract %88[0, 0, 0, 0] : f32 from vector<1x1x1x1xf32>
    %90 = arith.subf %0, %1 : vector<1x32x256xf32>
    %91 = arith.mulf %90, %90 : vector<1x32x256xf32>
    %92 = vector.broadcast %40 : vector<1x32x1xf32> to vector<1x32x256xf32>
    %93 = arith.mulf %91, %92 : vector<1x32x256xf32>
    %cst_36 = arith.constant dense<0.000000e+00> : vector<1x256xf32>
    %94 = vector.multi_reduction <add>, %93, %cst_36 [1] : vector<1x32x256xf32> to vector<1x256xf32>
    %95 = vector.shape_cast %94 : vector<1x256xf32> to vector<1x1x256xf32>
    %96 = arith.mulf %95, %22 : vector<1x1x256xf32>
    %97 = arith.mulf %96, %2 : vector<1x1x256xf32>
    %98 = vector.shape_cast %97 : vector<1x1x256xf32> to vector<1x1x1x256xf32>
    %cst_37 = arith.constant dense<0.000000e+00> : vector<1xf32>
    %99 = vector.multi_reduction <add>, %98, %cst_37 [1, 2, 3] : vector<1x1x1x256xf32> to vector<1xf32>
    %100 = vector.shape_cast %99 : vector<1xf32> to vector<1x1x1x1xf32>
    %101 = vector.extract %100[0, 0, 0, 0] : f32 from vector<1x1x1x1xf32>
    %102 = arith.mulf %96, %3 : vector<1x1x256xf32>
    %103 = vector.shape_cast %102 : vector<1x1x256xf32> to vector<1x1x1x256xf32>
    %cst_38 = arith.constant dense<0.000000e+00> : vector<1xf32>
    %104 = vector.multi_reduction <add>, %103, %cst_38 [1, 2, 3] : vector<1x1x1x256xf32> to vector<1xf32>
    %105 = vector.shape_cast %104 : vector<1xf32> to vector<1x1x1x1xf32>
    %106 = vector.extract %105[0, 0, 0, 0] : f32 from vector<1x1x1x1xf32>
    %c0_39 = arith.constant 0 : index
    %c0_40 = arith.constant 0 : index
    %107 = vector.load %arg5[%c0_39, %c0_40] : memref<1x32xf32, #tpu.memory_space<vmem>>, vector<1x32xf32>
    %108 = vector.shape_cast %107 : vector<1x32xf32> to vector<1x1x32xf32>
    "tpu.trace_start"() <{level = 10 : i32, message = "noc,nck->nok"}> : () -> ()
    %cst_41 = arith.constant dense<0.000000e+00> : vector<1x1x256xf32>
    %109 = tpu.matmul %108, %0, %cst_41 {dimension_numbers = #tpu.dot_dimension_numbers<[2], [1], [1], [2], [0, 0, 0, 1, 1, 2], [0], [0]>, precision = #tpu.contract_precision<fp32>} : vector<1x1x32xf32>, vector<1x32x256xf32>, vector<1x1x256xf32> -> vector<1x1x256xf32>
    "tpu.trace_stop"() : () -> ()
    %cst_42 = arith.constant dense<0xFF800000> : vector<1x1xf32>
    %110 = vector.multi_reduction <maximumf>, %109, %cst_42 [2] : vector<1x1x256xf32> to vector<1x1xf32>
    %111 = vector.shape_cast %110 : vector<1x1xf32> to vector<1x1x1xf32>
    %112 = vector.broadcast %111 : vector<1x1x1xf32> to vector<1x1x256xf32>
    %113 = arith.subf %109, %112 : vector<1x1x256xf32>
    %114 = math.exp %113 : vector<1x1x256xf32>
    %cst_43 = arith.constant dense<0.000000e+00> : vector<1x1xf32>
    %115 = vector.multi_reduction <add>, %114, %cst_43 [2] : vector<1x1x256xf32> to vector<1x1xf32>
    %116 = vector.shape_cast %115 : vector<1x1xf32> to vector<1x1x1xf32>
    %117 = tpu.reciprocal %116 {approx = true} : vector<1x1x1xf32> -> vector<1x1x1xf32>
    %118 = vector.broadcast %117 : vector<1x1x1xf32> to vector<1x1x256xf32>
    %119 = arith.mulf %114, %118 : vector<1x1x256xf32>
    %120 = vector.broadcast %119 : vector<1x1x256xf32> to vector<1x32x256xf32>
    %121 = arith.mulf %0, %120 : vector<1x32x256xf32>
    %cst_44 = arith.constant dense<0.000000e+00> : vector<1x32xf32>
    %122 = vector.multi_reduction <add>, %121, %cst_44 [2] : vector<1x32x256xf32> to vector<1x32xf32>
    %c0_45 = arith.constant 0 : index
    %c0_46 = arith.constant 0 : index
    %123 = vector.load %arg6[%c0_45, %c0_46] : memref<1x32xf32, #tpu.memory_space<vmem>>, vector<1x32xf32>
    %124 = vector.shape_cast %123 : vector<1x32xf32> to vector<1x1x32xf32>
    "tpu.trace_start"() <{level = 10 : i32, message = "noc,nck->nok"}> : () -> ()
    %cst_47 = arith.constant dense<0.000000e+00> : vector<1x1x256xf32>
    %125 = tpu.matmul %124, %1, %cst_47 {dimension_numbers = #tpu.dot_dimension_numbers<[2], [1], [1], [2], [0, 0, 0, 1, 1, 2], [0], [0]>, precision = #tpu.contract_precision<fp32>} : vector<1x1x32xf32>, vector<1x32x256xf32>, vector<1x1x256xf32> -> vector<1x1x256xf32>
    "tpu.trace_stop"() : () -> ()
    %cst_48 = arith.constant dense<0xFF800000> : vector<1x1xf32>
    %126 = vector.multi_reduction <maximumf>, %125, %cst_48 [2] : vector<1x1x256xf32> to vector<1x1xf32>
    %127 = vector.shape_cast %126 : vector<1x1xf32> to vector<1x1x1xf32>
    %128 = vector.broadcast %127 : vector<1x1x1xf32> to vector<1x1x256xf32>
    %129 = arith.subf %125, %128 : vector<1x1x256xf32>
    %130 = math.exp %129 : vector<1x1x256xf32>
    %cst_49 = arith.constant dense<0.000000e+00> : vector<1x1xf32>
    %131 = vector.multi_reduction <add>, %130, %cst_49 [2] : vector<1x1x256xf32> to vector<1x1xf32>
    %132 = vector.shape_cast %131 : vector<1x1xf32> to vector<1x1x1xf32>
    %133 = tpu.reciprocal %132 {approx = true} : vector<1x1x1xf32> -> vector<1x1x1xf32>
    %134 = vector.broadcast %133 : vector<1x1x1xf32> to vector<1x1x256xf32>
    %135 = arith.mulf %130, %134 : vector<1x1x256xf32>
    %136 = vector.broadcast %135 : vector<1x1x256xf32> to vector<1x32x256xf32>
    %137 = arith.mulf %1, %136 : vector<1x32x256xf32>
    %cst_50 = arith.constant dense<0.000000e+00> : vector<1x32xf32>
    %138 = vector.multi_reduction <add>, %137, %cst_50 [2] : vector<1x32x256xf32> to vector<1x32xf32>
    %c0_51 = arith.constant 0 : index
    %c0_52 = arith.constant 0 : index
    %139 = vector.load %arg7[%c0_51, %c0_52] : memref<32x16xf32, #tpu.memory_space<vmem>>, vector<32x16xf32>
    %c0_53 = arith.constant 0 : index
    %c0_54 = arith.constant 0 : index
    %140 = vector.load %arg8[%c0_53, %c0_54] : memref<16x32xf32, #tpu.memory_space<vmem>>, vector<16x32xf32>
    %cst_55 = arith.constant dense<0.000000e+00> : vector<1x16xf32>
    %141 = tpu.matmul %122, %139, %cst_55 {dimension_numbers = #tpu.dot_dimension_numbers<[1], [0], [0], [1], [0, 0, 1, 1], [], []>, precision = #tpu.contract_precision<fp32>} : vector<1x32xf32>, vector<32x16xf32>, vector<1x16xf32> -> vector<1x16xf32>
    %cst_56 = arith.constant dense<0.000000e+00> : vector<1xf32>
    %142 = vector.multi_reduction <add>, %141, %cst_56 [1] : vector<1x16xf32> to vector<1xf32>
    %143 = vector.shape_cast %142 : vector<1xf32> to vector<1x1xf32>
    %cst_57 = arith.constant 1.600000e+01 : f32
    %144 = vector.broadcast %cst_57 : f32 to vector<1x1xf32>
    %145 = arith.divf %143, %144 : vector<1x1xf32>
    %146 = vector.broadcast %145 : vector<1x1xf32> to vector<1x16xf32>
    %147 = arith.subf %141, %146 : vector<1x16xf32>
    %148 = arith.mulf %147, %147 : vector<1x16xf32>
    %cst_58 = arith.constant dense<0.000000e+00> : vector<1xf32>
    %149 = vector.multi_reduction <add>, %148, %cst_58 [1] : vector<1x16xf32> to vector<1xf32>
    %150 = vector.shape_cast %149 : vector<1xf32> to vector<1x1xf32>
    %cst_59 = arith.constant 1.600000e+01 : f32
    %151 = vector.broadcast %cst_59 : f32 to vector<1x1xf32>
    %152 = arith.divf %150, %151 : vector<1x1xf32>
    %153 = vector.broadcast %145 : vector<1x1xf32> to vector<1x16xf32>
    %154 = arith.subf %141, %153 : vector<1x16xf32>
    %cst_60 = arith.constant 9.99999974E-6 : f32
    %155 = vector.broadcast %cst_60 : f32 to vector<1x1xf32>
    %156 = arith.addf %152, %155 : vector<1x1xf32>
    %157 = math.rsqrt %156 : vector<1x1xf32>
    %158 = vector.broadcast %157 : vector<1x1xf32> to vector<1x16xf32>
    %159 = arith.mulf %154, %158 : vector<1x16xf32>
    %cst_61 = arith.constant 0.000000e+00 : f32
    %160 = vector.broadcast %cst_61 : f32 to vector<1x16xf32>
    %161 = arith.maximumf %159, %160 : vector<1x16xf32>
    %cst_62 = arith.constant dense<0.000000e+00> : vector<1x32xf32>
    %162 = tpu.matmul %161, %140, %cst_62 {dimension_numbers = #tpu.dot_dimension_numbers<[1], [0], [0], [1], [0, 0, 1, 1], [], []>, precision = #tpu.contract_precision<fp32>} : vector<1x16xf32>, vector<16x32xf32>, vector<1x32xf32> -> vector<1x32xf32>
    %c0_63 = arith.constant 0 : index
    %c0_64 = arith.constant 0 : index
    %163 = vector.load %arg9[%c0_63, %c0_64] : memref<32x16xf32, #tpu.memory_space<vmem>>, vector<32x16xf32>
    %c0_65 = arith.constant 0 : index
    %c0_66 = arith.constant 0 : index
    %164 = vector.load %arg10[%c0_65, %c0_66] : memref<16x32xf32, #tpu.memory_space<vmem>>, vector<16x32xf32>
    %cst_67 = arith.constant dense<0.000000e+00> : vector<1x16xf32>
    %165 = tpu.matmul %138, %163, %cst_67 {dimension_numbers = #tpu.dot_dimension_numbers<[1], [0], [0], [1], [0, 0, 1, 1], [], []>, precision = #tpu.contract_precision<fp32>} : vector<1x32xf32>, vector<32x16xf32>, vector<1x16xf32> -> vector<1x16xf32>
    %cst_68 = arith.constant dense<0.000000e+00> : vector<1xf32>
    %166 = vector.multi_reduction <add>, %165, %cst_68 [1] : vector<1x16xf32> to vector<1xf32>
    %167 = vector.shape_cast %166 : vector<1xf32> to vector<1x1xf32>
    %cst_69 = arith.constant 1.600000e+01 : f32
    %168 = vector.broadcast %cst_69 : f32 to vector<1x1xf32>
    %169 = arith.divf %167, %168 : vector<1x1xf32>
    %170 = vector.broadcast %169 : vector<1x1xf32> to vector<1x16xf32>
    %171 = arith.subf %165, %170 : vector<1x16xf32>
    %172 = arith.mulf %171, %171 : vector<1x16xf32>
    %cst_70 = arith.constant dense<0.000000e+00> : vector<1xf32>
    %173 = vector.multi_reduction <add>, %172, %cst_70 [1] : vector<1x16xf32> to vector<1xf32>
    %174 = vector.shape_cast %173 : vector<1xf32> to vector<1x1xf32>
    %cst_71 = arith.constant 1.600000e+01 : f32
    %175 = vector.broadcast %cst_71 : f32 to vector<1x1xf32>
    %176 = arith.divf %174, %175 : vector<1x1xf32>
    %177 = vector.broadcast %169 : vector<1x1xf32> to vector<1x16xf32>
    %178 = arith.subf %165, %177 : vector<1x16xf32>
    %cst_72 = arith.constant 9.99999974E-6 : f32
    %179 = vector.broadcast %cst_72 : f32 to vector<1x1xf32>
    %180 = arith.addf %176, %179 : vector<1x1xf32>
    %181 = math.rsqrt %180 : vector<1x1xf32>
    %182 = vector.broadcast %181 : vector<1x1xf32> to vector<1x16xf32>
    %183 = arith.mulf %178, %182 : vector<1x16xf32>
    %cst_73 = arith.constant 0.000000e+00 : f32
    %184 = vector.broadcast %cst_73 : f32 to vector<1x16xf32>
    %185 = arith.maximumf %183, %184 : vector<1x16xf32>
    %cst_74 = arith.constant dense<0.000000e+00> : vector<1x32xf32>
    %186 = tpu.matmul %185, %164, %cst_74 {dimension_numbers = #tpu.dot_dimension_numbers<[1], [0], [0], [1], [0, 0, 1, 1], [], []>, precision = #tpu.contract_precision<fp32>} : vector<1x16xf32>, vector<16x32xf32>, vector<1x32xf32> -> vector<1x32xf32>
    %187 = arith.subf %162, %186 : vector<1x32xf32>
    %cst_75 = arith.constant dense<0.000000e+00> : vector<1x32xf32>
    %188 = vector.multi_reduction <add>, %90, %cst_75 [2] : vector<1x32x256xf32> to vector<1x32xf32>
    %189 = vector.shape_cast %91 : vector<1x32x256xf32> to vector<1x1x32x256xf32>
    %cst_76 = arith.constant dense<0.000000e+00> : vector<1xf32>
    %190 = vector.multi_reduction <add>, %189, %cst_76 [1, 2, 3] : vector<1x1x32x256xf32> to vector<1xf32>
    %191 = vector.shape_cast %190 : vector<1xf32> to vector<1x1x1x1xf32>
    %192 = vector.extract %191[0, 0, 0, 0] : f32 from vector<1x1x1x1xf32>
    %193 = arith.mulf %187, %188 : vector<1x32xf32>
    %194 = vector.shape_cast %193 : vector<1x32xf32> to vector<1x1x32xf32>
    %cst_77 = arith.constant dense<0.000000e+00> : vector<1xf32>
    %195 = vector.multi_reduction <add>, %194, %cst_77 [1, 2] : vector<1x1x32xf32> to vector<1xf32>
    %196 = vector.shape_cast %195 : vector<1xf32> to vector<1x1x1xf32>
    %197 = vector.extract %196[0, 0, 0] : f32 from vector<1x1x1xf32>
    %cst_78 = arith.constant 2.000000e+00 : f32
    %198 = arith.mulf %cst_78, %197 : f32
    %199 = arith.addf %192, %198 : f32
    %200 = arith.mulf %187, %187 : vector<1x32xf32>
    %201 = vector.shape_cast %200 : vector<1x32xf32> to vector<1x1x32xf32>
    %cst_79 = arith.constant dense<0.000000e+00> : vector<1xf32>
    %202 = vector.multi_reduction <add>, %201, %cst_79 [1, 2] : vector<1x1x32xf32> to vector<1xf32>
    %203 = vector.shape_cast %202 : vector<1xf32> to vector<1x1x1xf32>
    %204 = vector.extract %203[0, 0, 0] : f32 from vector<1x1x1xf32>
    %cst_80 = arith.constant 2.560000e+02 : f32
    %205 = arith.mulf %cst_80, %204 : f32
    %206 = arith.addf %199, %205 : f32
    %207 = tpu.iota {dimensions = array<i32: 2>} : vector<1x8x128xi32>
    %c0_i32 = arith.constant 0 : i32
    %208 = vector.broadcast %c0_i32 : i32 to vector<1x8x128xi32>
    %209 = arith.cmpi eq, %207, %208 : vector<1x8x128xi32>
    %cst_81 = arith.constant 0.000000e+00 : f32
    %210 = vector.broadcast %101 : f32 to vector<1x8x128xf32>
    %211 = vector.broadcast %cst_81 : f32 to vector<1x8x128xf32>
    %212 = arith.select %209, %210, %211 : vector<1x8x128xi1>, vector<1x8x128xf32>
    %c1_i32 = arith.constant 1 : i32
    %213 = vector.broadcast %c1_i32 : i32 to vector<1x8x128xi32>
    %214 = arith.cmpi eq, %207, %213 : vector<1x8x128xi32>
    %cst_82 = arith.constant 0.000000e+00 : f32
    %215 = vector.broadcast %106 : f32 to vector<1x8x128xf32>
    %216 = vector.broadcast %cst_82 : f32 to vector<1x8x128xf32>
    %217 = arith.select %214, %215, %216 : vector<1x8x128xi1>, vector<1x8x128xf32>
    %218 = arith.addf %212, %217 : vector<1x8x128xf32>
    %c2_i32 = arith.constant 2 : i32
    %219 = vector.broadcast %c2_i32 : i32 to vector<1x8x128xi32>
    %220 = arith.cmpi eq, %207, %219 : vector<1x8x128xi32>
    %cst_83 = arith.constant 0.000000e+00 : f32
    %221 = vector.broadcast %83 : f32 to vector<1x8x128xf32>
    %222 = vector.broadcast %cst_83 : f32 to vector<1x8x128xf32>
    %223 = arith.select %220, %221, %222 : vector<1x8x128xi1>, vector<1x8x128xf32>
    %224 = arith.addf %218, %223 : vector<1x8x128xf32>
    %c3_i32 = arith.constant 3 : i32
    %225 = vector.broadcast %c3_i32 : i32 to vector<1x8x128xi32>
    %226 = arith.cmpi eq, %207, %225 : vector<1x8x128xi32>
    %cst_84 = arith.constant 0.000000e+00 : f32
    %227 = vector.broadcast %89 : f32 to vector<1x8x128xf32>
    %228 = vector.broadcast %cst_84 : f32 to vector<1x8x128xf32>
    %229 = arith.select %226, %227, %228 : vector<1x8x128xi1>, vector<1x8x128xf32>
    %230 = arith.addf %224, %229 : vector<1x8x128xf32>
    %c4_i32 = arith.constant 4 : i32
    %231 = vector.broadcast %c4_i32 : i32 to vector<1x8x128xi32>
    %232 = arith.cmpi eq, %207, %231 : vector<1x8x128xi32>
    %cst_85 = arith.constant 0.000000e+00 : f32
    %233 = vector.broadcast %206 : f32 to vector<1x8x128xf32>
    %234 = vector.broadcast %cst_85 : f32 to vector<1x8x128xf32>
    %235 = arith.select %232, %233, %234 : vector<1x8x128xi1>, vector<1x8x128xf32>
    %236 = arith.addf %230, %235 : vector<1x8x128xf32>
    %c0_86 = arith.constant 0 : index
    %c0_87 = arith.constant 0 : index
    %c0_88 = arith.constant 0 : index
    %237 = vector.load %arg11[%c0_86, %c0_87, %c0_88] : memref<1x8x128xf32, #tpu.memory_space<vmem>>, vector<1x8x128xf32>
    tpu.vector_store %arg11[%c0_86, %c0_87, %c0_88], %236 {strides = array<i32>} : memref<1x8x128xf32, #tpu.memory_space<vmem>>, vector<1x8x128xf32>,
    return
  }
  func.func @transform_0(%arg0: i32) -> (i32, i32, i32) {
    %c0_i32 = arith.constant 0 : i32
    %c0_i32_0 = arith.constant 0 : i32
    %c0_i32_1 = arith.constant 0 : i32
    return %arg0, %c0_i32, %c0_i32_0 : i32, i32, i32
  }
  func.func @transform_1(%arg0: i32) -> (i32, i32, i32) {
    %c0_i32 = arith.constant 0 : i32
    %c0_i32_0 = arith.constant 0 : i32
    %c0_i32_1 = arith.constant 0 : i32
    return %arg0, %c0_i32, %c0_i32_0 : i32, i32, i32
  }
  func.func @transform_2(%arg0: i32) -> (i32, i32, i32) {
    %c0_i32 = arith.constant 0 : i32
    %c0_i32_0 = arith.constant 0 : i32
    %c0_i32_1 = arith.constant 0 : i32
    return %arg0, %c0_i32, %c0_i32_0 : i32, i32, i32
  }
  func.func @transform_3(%arg0: i32) -> (i32, i32, i32) {
    %c0_i32 = arith.constant 0 : i32
    %c0_i32_0 = arith.constant 0 : i32
    %c0_i32_1 = arith.constant 0 : i32
    return %arg0, %c0_i32, %c0_i32_0 : i32, i32, i32
  }
  func.func @transform_4(%arg0: i32) -> (i32, i32) {
    %c0_i32 = arith.constant 0 : i32
    %c0_i32_0 = arith.constant 0 : i32
    %c0_i32_1 = arith.constant 0 : i32
    return %c0_i32, %c0_i32_0 : i32, i32
  }
  func.func @transform_5(%arg0: i32) -> (i32, i32) {
    %c0_i32 = arith.constant 0 : i32
    %c0_i32_0 = arith.constant 0 : i32
    %c0_i32_1 = arith.constant 0 : i32
    return %c0_i32, %c0_i32_0 : i32, i32
  }
  func.func @transform_6(%arg0: i32) -> (i32, i32) {
    %c0_i32 = arith.constant 0 : i32
    %c0_i32_0 = arith.constant 0 : i32
    %c0_i32_1 = arith.constant 0 : i32
    return %c0_i32, %c0_i32_0 : i32, i32
  }
  func.func @transform_7(%arg0: i32) -> (i32, i32) {
    %c0_i32 = arith.constant 0 : i32
    %c0_i32_0 = arith.constant 0 : i32
    %c0_i32_1 = arith.constant 0 : i32
    return %c0_i32, %c0_i32_0 : i32, i32
  }
  func.func @transform_8(%arg0: i32) -> (i32, i32) {
    %c0_i32 = arith.constant 0 : i32
    %c0_i32_0 = arith.constant 0 : i32
    %c0_i32_1 = arith.constant 0 : i32
    return %c0_i32, %c0_i32_0 : i32, i32
  }
  func.func @transform_9(%arg0: i32) -> (i32, i32) {
    %c0_i32 = arith.constant 0 : i32
    %c0_i32_0 = arith.constant 0 : i32
    %c0_i32_1 = arith.constant 0 : i32
    return %c0_i32, %c0_i32_0 : i32, i32
  }
  func.func @transform_10(%arg0: i32) -> (i32, i32, i32) {
    %c0_i32 = arith.constant 0 : i32
    %c0_i32_0 = arith.constant 0 : i32
    %c0_i32_1 = arith.constant 0 : i32
    return %arg0, %c0_i32, %c0_i32_0 : i32, i32, i32
  }
}

</mosaic_0001>

<bundles_post_ra>
// kernel: tpu_custom_call.1
= control target key start
LH: loop header
LB: loop body
LE: loop exit
PB: predicated region body
PF: predicated region fallthrough
CT: control target
= control target key end

     0   :  { %s6850_s0 = inlined_call_operand.hbm [shape: f32[2,32,256], index: 0, kind: input, shape index: {}]   ;;  %s6851_s1 = inlined_call_operand.hbm [shape: f32[2,32,256], index: 1, kind: input, shape index: {}]   ;;  %s6852_s2 = inlined_call_operand.hbm [shape: f32[2,1,256], index: 2, kind: input, shape index: {}]   ;;  %s6853_s3 = inlined_call_operand.hbm [shape: f32[2,1,256], index: 3, kind: input, shape index: {}]   ;;  %s6854_s4 = inlined_call_operand.hbm [shape: f32[1,32], index: 4, kind: input, shape index: {}]   ;;  %s6855_s5 = inlined_call_operand.hbm [shape: f32[1,32], index: 5, kind: input, shape index: {}]   ;;  %s6856_s6 = inlined_call_operand.hbm [shape: f32[32,16], index: 6, kind: input, shape index: {}]   ;;  %s6857_s7 = inlined_call_operand.hbm [shape: f32[16,32], index: 7, kind: input, shape index: {}]   ;;  %s6858_s8 = inlined_call_operand.hbm [shape: f32[32,16], index: 8, kind: input, shape index: {}]   ;;  %s6859_s9 = inlined_call_operand.hbm [shape: f32[16,32], index: 9, kind: input, shape index: {}]   ;;  %s6860_s10 = inlined_call_operand.hbm [shape: f32[2,8,128], index: 10, kind: output, shape index: {}]  }
   0x1   :  { %6891 = sst [smem:[#allocation35_spill]] %s6851_s1 }
   0x2   :  { %6892 = sst [smem:[#allocation36_spill]] %s6854_s4 }
   0x3   :  { %6893 = sst [smem:[#allocation37_spill]] %s6855_s5 }
   0x4   :  { %6894 = sst [smem:[#allocation38_spill]] %s6857_s7 }
   0x5   :  { %6895 = sst [smem:[#allocation39_spill]] %s6860_s10 }
   0x6   :  { %15 = vsyncpa [#allocation3], 0 }
   0x7   :  { %17 = vsyncpa [#allocation3 + $0x1], 0 }
   0x8   :  { %18 = vsyncpa [#allocation6], 0 }
   0x9   :  { %20 = vsyncpa [#allocation6 + $0x1], 0 }
   0xa   :  { %21 = vsyncpa [#allocation9], 0 }
   0xb   :  { %23 = vsyncpa [#allocation9 + $0x1], 0 }
   0xc   :  { %24 = vsyncpa [#allocation12], 0 }
   0xd   :  { %25 = vsyncpa [#allocation15], 0 }
   0xe   :  { %26 = vsyncpa [#allocation18], 0 }
   0xf   :  { %27 = vsyncpa [#allocation4], 0 }
  0x10   :  { %29 = vsyncpa [#allocation4 + $0x1], 0  ;;  %s5710_s13 = smov 0   ;;  %s5712_s14 = smov 0  }
  0x11   :  { %s5714_s15 = smov 0   ;;  %s5716_s16 = smov 0  }
  0x12 LB: > { %6896 = sst [smem:[#allocation28_spill]] %s5623_s13  ;;  %s5637_s17 = smov [#allocation10]   ;;  %s5635_s16 = sphi %s5716_s16, %s6945_s16   ;;  %s5631_s15 = sphi %s5714_s15, %s6947_s15   ;;  %s5627_s14 = sphi %s5712_s14, %s6949_s14   ;;  %s5623_s13 = sphi %s5710_s13, %s6948_s13  }
  0x13   : > { %6897 = sst [smem:[#allocation29_spill]] %s5631_s15  ;;  %s309_s18 = sshll.u32 %s5637_s17, 4  ;;  %s5736_s18 = int_to_ptr.vmem [resolvable:$true] %s309_s18 }
  0x14   : > { %s5731_s19 = sadd.s32 4294967295, %s5635_s16   ;;  %p4434_p0 = scmp.ge.s32.totalorder %s5635_s16, 1 }
  0x15   : > { %6898 = sst [smem:[#allocation30_spill]] %s5731_s19  ;;  %p6871_p1 = scmp.eq.s32.totalorder %s5731_s19, 0 }
  0x16   : > { %p296_p2 = scmp.lt.s32.totalorder %s5635_s16, 3  ;;  %s5638_s21 = smov [#allocation11]  }
  0x17   : > { %s320_s22 = sshll.u32 %s5638_s21, 4  ;;  %s5639_s24 = smov [#allocation14]   ;;  %s5745_s22 = int_to_ptr.vmem [resolvable:$true] %s320_s22 }
  0x18   : > { %p5738_p3 = pnand %p4434_p0, %p296_p2  ;;  %s343_s25 = sshll.u32 %s5639_s24, 4  ;;  %s5753_s25 = int_to_ptr.vmem [resolvable:$true] %s343_s25 }
  0x19   : > { %s6901_s4 = sld [smem:[#allocation36_spill]] }
  0x1a   : > { %s6899_s20 = scalar_select %p5738_p3, 1, 0 }
  0x1b   : > { %p5098_p5 = pneg %p5738_p3 }
  0x1d   : > { %p5749_p6 = pnand %p5098_p5, %p6871_p1 }
  0x1f   : > { %s6900_s23 = scalar_select %p5749_p6, 1, 0 }
  0x20   : > { %s5257_s28 = scalar_lea.hbm %s6901_s4, 16  ;;  %p5763_p8 = pneg %p5749_p6 }
  0x21   : > { %p5258_p7 = scmp.ne.s32.totalorder %s6901_s4, %s5257_s28  ;;  %p5264_p11 = scmp.lt.u32.totalorder %s5257_s28, %s6901_s4 }
  0x22   : > { %s6902_s11 = scalar_select %p5763_p8, 1, 0 }
  0x23   : > { %p5260_p9 = pnand %p5763_p8, %p5258_p7 }
  0x25   : > { %p5261_p10 = pneg %p5260_p9 }
  0x27   : > { %p5266_p12 = pnand %p5264_p11, %p5261_p10 }
  0x29   : > { %5269 = shalt.err (!%p5266_p12)
}
  0x2a   : > { %s5270_s21 = scalar_lea.vmem %s5736_s18, 16  ;;  %s5277_s24 = scalar_lea.vmem %s5736_s18, 32 }
  0x2b   : > { %p5271_p13 = scmp.ne.s32.totalorder %s5736_s18, %s5270_s21  ;;  %p5278_p5 = scmp.lt.s32.totalorder %s5736_s18, %s5736_s18 }
  0x2c   : > { %p5279_p7 = scmp.lt.s32.totalorder %s5277_s24, %s5270_s21 }
  0x2d   : > { %p5273_p0 = pnand %p5271_p13, %p5763_p8 }
  0x2e   : > { %p5280_p9 = por %p5279_p7, %p5278_p5 }
  0x2f   : > { %p5274_p2 = pneg %p5273_p0 }
  0x31   : > { %p5281_p4 = pnand %p5280_p9, %p5274_p2 }
  0x33   : > { %5284 = shalt.err (!%p5281_p4)
}
  0x34   : > { %5101 = dma.hbm_to_vmem [thread:$0]  (!%p5749_p6), %s6901_s4, 16, %s5736_s18, [#allocation9]  }
  0x35   : > { %s6903_s5 = sld [smem:[#allocation37_spill]] }
  0x3b   : > { %s5285_s30 = scalar_lea.hbm %s6903_s5, 16 }
  0x3c   : > { %p5286_p10 = scmp.ne.s32.totalorder %s6903_s5, %s5285_s30  ;;  %p5292_p4 = scmp.lt.u32.totalorder %s5285_s30, %s6903_s5 }
  0x3e   : > { %p5288_p11 = pnand %p5286_p10, %p5763_p8 }
  0x40   : > { %p5289_p12 = pneg %p5288_p11 }
  0x42   : > { %p5294_p13 = pnand %p5292_p4, %p5289_p12 }
  0x44   : > { %5297 = shalt.err (!%p5294_p13)
}
  0x45   : > { %s5298_s18 = scalar_lea.vmem %s5745_s22, 16  ;;  %s5305_s26 = scalar_lea.vmem %s5745_s22, 32 }
  0x46   : > { %p5299_p0 = scmp.ne.s32.totalorder %s5745_s22, %s5298_s18  ;;  %p5306_p7 = scmp.lt.s32.totalorder %s5745_s22, %s5745_s22 }
  0x47   : > { %p5307_p9 = scmp.lt.s32.totalorder %s5305_s26, %s5298_s18 }
  0x48   : > { %p5301_p2 = pnand %p5299_p0, %p5763_p8 }
  0x49   : > { %p5308_p10 = por %p5307_p9, %p5306_p7 }
  0x4a   : > { %p5302_p5 = pneg %p5301_p2 }
  0x4c   : > { %p5309_p11 = pnand %p5308_p10, %p5302_p5 }
  0x4e   : > { %5312 = shalt.err (!%p5309_p11)
}
  0x4f   : > { %5104 = dma.hbm_to_vmem [thread:$0]  (!%p5749_p6), %s6903_s5, 16, %s5745_s22, [#allocation12]  }
  0x50   : > { %s6904_s7 = sld [smem:[#allocation38_spill]] }
  0x56   : > { %s5313_s12 = scalar_lea.hbm %s6904_s7, 256 }
  0x57   : > { %p5314_p12 = scmp.ne.s32.totalorder %s6904_s7, %s5313_s12  ;;  %p5320_p0 = scmp.lt.u32.totalorder %s5313_s12, %s6904_s7 }
  0x59   : > { %p5316_p4 = pnand %p5314_p12, %p5763_p8 }
  0x5b   : > { %p5317_p13 = pneg %p5316_p4 }
  0x5d   : > { %p5322_p2 = pnand %p5320_p0, %p5317_p13 }
  0x5f   : > { %5325 = shalt.err (!%p5322_p2)
}
  0x60   : > { %s5326_s22 = scalar_lea.vmem %s5753_s25, 256  ;;  %p5334_p10 = scmp.lt.s32.totalorder %s5753_s25, %s5753_s25 }
  0x61   : > { %p5327_p5 = scmp.ne.s32.totalorder %s5753_s25, %s5326_s22  ;;  %p5335_p11 = scmp.lt.s32.totalorder %s5326_s22, %s5326_s22 }
  0x63   : > { %p5329_p7 = pnand %p5327_p5, %p5763_p8  ;;  %p5336_p12 = por %p5335_p11, %p5334_p10 }
  0x65   : > { %p5330_p9 = pneg %p5329_p7 }
  0x67   : > { %p5337_p4 = pnand %p5336_p12, %p5330_p9 }
  0x69   : > { %5340 = shalt.err (!%p5337_p4)
}
  0x6a   : > { %s6862_s26 = smov 128   ;;  %s6864_s27 = smov 8  }
  0x6b   : > { %5110 = dma.hbm_to_vmem [thread:$0]  (!%p5749_p6), %s6904_s7, 256, %s5753_s25, [#allocation15], %s6862_s26, %s6862_s26, %s6864_s27  }
  0x6c   : > { %s4433_s30 = sadd.s32 4294967294, %s5635_s16   ;;  %s5837_s12 = sadd.s32 1, %s5635_s16  }
  0x6d   : > { %6905 = sst [smem:[#allocation31_spill]] %s5837_s12  ;;  %s42_s17 = sadd.s32 1, %s5631_s15 }
  0x6e   : > { %s39_s21 = ssub.s32 %s5635_s16, %s5837_s12  ;;  %p49_p13 = scmp.ne.s32.totalorder %s5631_s15, %s5627_s14 }
  0x6f   : > { %p40_p0 = scmp.eq.s32.totalorder %s39_s21, 0  ;;  %p50_p2 = scmp.eq.s32.totalorder %s5635_s16, 0 }
  0x70   : > { %p55_p5 = scmp.ne.s32.totalorder %s5627_s14, %s5623_s13  ;;  %p283_p7 = scmp.eq.s32.totalorder %s5731_s19, 1 }
  0x71   : > { %s5849_s24 = scalar_select %p40_p0, %s5631_s15, %s42_s17  }
  0x72   : > { %p51_p9 = por %p50_p2, %p49_p13  ;;  %p5853_p10 = por %p6871_p1, %p55_p5 }
  0x73   : > { %6906 = sst [smem:[#allocation32_spill]] %s5849_s24  ;;  %p5857_p11 = por %p283_p7, %p49_p13 }
  0x74   : > { %s6907_s25 = scalar_select %p5853_p10, 1, 0 }
  0x75   : > { %s6908_s18 = scalar_select %p5857_p11, 1, 0 }
  0x76   : > { %p289_p12 = scmp.eq.s32.totalorder %s4433_s30, 1  ;;  %p5140_p4 = scmp.lt.s32.totalorder %s5635_s16, 2 }
  0x77   : > { %6909 = sst [smem:[#allocation33_spill]] %s6908_s18  ;;  %s5863_s22 = sand.u32 1, %s5631_s15  }
  0x78   : > { %p5865_p3 = por %p289_p12, %p55_p5  ;;  %s6869_s29 = sshll.u32 %s5863_s22, 6 }
  0x79   : > { %s6870_s17 = sshll.u32 %s5635_s16, 10  ;;  %p5871_p0 = pnand %p5140_p4, %p51_p9 }
  0x7a   : > { %s6910_s28 = scalar_select %p5865_p3, 1, 0 }
  0x7b   : > { %s6912_s21 = scalar_select %p5871_p0, 1, 0 }
  0x7c   : > { %6911 = sst [smem:[#allocation34_spill]] %s6910_s28  ;;  %s6873_s26 = sand.u32 1, %s5635_s16  }
  0x7d   : > { %s6913_s1 = sld [smem:[#allocation35_spill]]  ;;  %s408_s5 = scalar_lea.vmem [#allocation5], %s6869_s29 }
  0x7e   : > { %s415_s7 = sshll.u32 %s408_s5, 4  ;;  %s5889_s24 = scalar_lea.sflag [#allocation6], %s6873_s26  ;;  %s5885_s7 = int_to_ptr.vmem [resolvable:$true] %s415_s7 }
  0x7f   : > { %p5895_p2 = pneg %p5871_p0 }
  0x81   : > { %s6914_s12 = scalar_select %p5895_p2, 1, 0 }
  0x83   : > { %s5881_s4 = scalar_lea.hbm %s6913_s1, %s6870_s17  ;;  %s5346_s5 = scalar_lea.hbm %s6913_s1, 2048 }
  0x84   : > { %s5341_s15 = scalar_lea.hbm %s5881_s4, 1024  ;;  %p5347_p9 = scmp.lt.u32.totalorder %s5881_s4, %s6913_s1 }
  0x85   : > { %p5342_p13 = scmp.ne.s32.totalorder %s5881_s4, %s5341_s15  ;;  %p5348_p12 = scmp.lt.u32.totalorder %s5346_s5, %s5341_s15 }
  0x86   : > { %p5350_p1 = scmp.lt.u32.totalorder %s5341_s15, %s5881_s4 }
  0x87   : > { %p5344_p5 = pnand %p5895_p2, %p5342_p13  ;;  %p5349_p4 = por %p5348_p12, %p5347_p9 }
  0x89   : > { %p5345_p7 = pneg %p5344_p5  ;;  %p5351_p3 = por %p5350_p1, %p5349_p4 }
  0x8b   : > { %p5352_p11 = pnand %p5351_p3, %p5345_p7 }
  0x8d   : > { %5355 = shalt.err (!%p5352_p11)
}
  0x8e   : > { %s5356_s26 = scalar_lea.vmem %s5885_s7, 1024  ;;  %s5642_s27 = smov [#allocation5]  }
  0x8f   : > { %p5357_p13 = scmp.ne.s32.totalorder %s5885_s7, %s5356_s26  ;;  %s5361_s30 = sshll.u32 %s5642_s27, 4  ;;  %s5362_s30 = int_to_ptr.vmem [resolvable:$false] %s5361_s30 }
  0x90   : > { %s5363_s29 = scalar_lea.vmem %s5362_s30, 2048  ;;  %p5364_p6 = scmp.lt.s32.totalorder %s5885_s7, %s5362_s30 }
  0x91   : > { %p5359_p5 = pnand %p5357_p13, %p5895_p2  ;;  %p5365_p8 = scmp.lt.s32.totalorder %s5363_s29, %s5356_s26 }
  0x93   : > { %p5360_p10 = pneg %p5359_p5  ;;  %p5366_p9 = por %p5365_p8, %p5364_p6 }
  0x95   : > { %p5367_p12 = pnand %p5366_p9, %p5360_p10 }
  0x97   : > { %5370 = shalt.err (!%p5367_p12)
}
  0x98   : > { %s6890_s15 = smov 256   ;;  %s5644_s17 = smov 16  }
  0x99   : > { %5123 = dma.hbm_to_vmem [thread:$0]  (!%p5871_p0), %s5881_s4, 1024, %s5885_s7, %s5889_s24, %s6890_s15, %s6890_s15, %s5644_s17  }
  0x9a   : > { %s5645_s5 = smov [#allocation13]   ;;  %s5646_s30 = smov [#allocation16]  }
  0x9b   : > { %s330_s27 = sshll.u32 %s5645_s5, 4  ;;  %s356_s26 = sshll.u32 %s5646_s30, 4  ;;  %s331_s27 = int_to_ptr.vmem [resolvable:$true] %s330_s27  ;;  %s357_s26 = int_to_ptr.vmem [resolvable:$true] %s356_s26 }
  0x9c   : > { %s5371_s28 = scalar_lea.hbm %s6856_s6, 512  ;;  %p6915_p3 = scmp.ne.s32.totalorder %s6902_s11, 0 }
  0x9d   : > { %p5372_p1 = scmp.ne.s32.totalorder %s6856_s6, %s5371_s28  ;;  %p5378_p10 = scmp.lt.u32.totalorder %s5371_s28, %s6856_s6 }
  0x9f   : > { %p5374_p6 = pnand %p5372_p1, %p6915_p3 }
  0xa1   : > { %p5375_p8 = pneg %p5374_p6 }
  0xa3   : > { %p5380_p11 = pnand %p5378_p10, %p5375_p8 }
  0xa5   : > { %5383 = shalt.err (!%p5380_p11)
}
  0xa6   : > { %s5384_s4 = scalar_lea.vmem %s331_s27, 512  ;;  %p5392_p5 = scmp.lt.s32.totalorder %s331_s27, %s331_s27 }
  0xa7   : > { %p5385_p7 = scmp.ne.s32.totalorder %s331_s27, %s5384_s4  ;;  %p5393_p9 = scmp.lt.s32.totalorder %s5384_s4, %s5384_s4 }
  0xa9   : > { %p5387_p4 = pnand %p5385_p7, %p6915_p3  ;;  %p5394_p12 = por %p5393_p9, %p5392_p5 }
  0xab   : > { %p5388_p13 = pneg %p5387_p4 }
  0xad   : > { %p5395_p0 = pnand %p5394_p12, %p5388_p13 }
  0xaf   : > { %5398 = shalt.err (!%p5395_p0)
}
  0xb0   : > { %p6916_p1 = scmp.ne.s32.totalorder %s6900_s23, 0  ;;  %s6917_s1 = smov 8  }
  0xb1   : > { %s6918_s7 = smov 128   ;;  %s5399_s28 = scalar_lea.hbm %s6858_s8, 512 }
  0xb2   : > { %5107 = dma.hbm_to_vmem [thread:$0]  (!%p6916_p1), %s6856_s6, 512, %s331_s27, [#allocation12], %s6918_s7, %s6918_s7, %s6917_s1  }
  0xb3   : > { %p5400_p6 = scmp.ne.s32.totalorder %s6858_s8, %s5399_s28  ;;  %p5406_p10 = scmp.lt.u32.totalorder %s5399_s28, %s6858_s8 }
  0xb5   : > { %p5402_p0 = pnand %p5400_p6, %p6915_p3 }
  0xb7   : > { %p5403_p8 = pneg %p5402_p0 }
  0xb9   : > { %p5408_p11 = pnand %p5406_p10, %p5403_p8 }
  0xbb   : > { %5411 = shalt.err (!%p5408_p11)
}
  0xbc   : > { %s5412_s10 = scalar_lea.vmem %s357_s26, 512  ;;  %p5420_p5 = scmp.lt.s32.totalorder %s357_s26, %s357_s26 }
  0xbd   : > { %p5413_p7 = scmp.ne.s32.totalorder %s357_s26, %s5412_s10  ;;  %p5421_p9 = scmp.lt.s32.totalorder %s5412_s10, %s5412_s10 }
  0xbf   : > { %p5415_p4 = pnand %p5413_p7, %p6915_p3  ;;  %p5422_p12 = por %p5421_p9, %p5420_p5 }
  0xc1   : > { %p5416_p13 = pneg %p5415_p4 }
  0xc3   : > { %p5423_p2 = pnand %p5422_p12, %p5416_p13 }
  0xc5   : > { %5426 = shalt.err (!%p5423_p2)
}
  0xc6   : > { %5113 = dma.hbm_to_vmem [thread:$0]  (!%p6916_p1), %s6858_s8, 512, %s357_s26, [#allocation15], %s6918_s7, %s6918_s7, %s6917_s1  }
  0xc7   : > { %s5647_s19 = smov [#allocation17]   ;;  %s5427_s30 = scalar_lea.hbm %s6859_s9, 256 }
  0xc8   : > { %s369_s18 = sshll.u32 %s5647_s19, 4  ;;  %p5428_p2 = scmp.ne.s32.totalorder %s6859_s9, %s5427_s30  ;;  %s370_s18 = int_to_ptr.vmem [resolvable:$true] %s369_s18 }
  0xc9   : > { %p5434_p8 = scmp.lt.u32.totalorder %s5427_s30, %s6859_s9 }
  0xca   : > { %p5430_p6 = pnand %p5428_p2, %p6915_p3 }
  0xcc   : > { %p5431_p0 = pneg %p5430_p6 }
  0xce   : > { %p5436_p10 = pnand %p5434_p8, %p5431_p0 }
  0xd0   : > { %5439 = shalt.err (!%p5436_p10)
}
  0xd1   : > { %s5440_s26 = scalar_lea.vmem %s370_s18, 256  ;;  %p5448_p13 = scmp.lt.s32.totalorder %s370_s18, %s370_s18 }
  0xd2   : > { %p5441_p11 = scmp.ne.s32.totalorder %s370_s18, %s5440_s26  ;;  %p5449_p5 = scmp.lt.s32.totalorder %s5440_s26, %s5440_s26 }
  0xd4   : > { %p5443_p7 = pnand %p5441_p11, %p6915_p3  ;;  %p5450_p9 = por %p5449_p5, %p5448_p13 }
  0xd6   : > { %p5444_p4 = pneg %p5443_p7 }
  0xd8   : > { %p5451_p12 = pnand %p5450_p9, %p5444_p4 }
  0xda   : > { %5454 = shalt.err (!%p5451_p12)
}
  0xdb   : > { %5116 = dma.hbm_to_vmem [thread:$0]  (!%p6916_p1), %s6859_s9, 256, %s370_s18, [#allocation18], %s6918_s7, %s6918_s7, %s6917_s1  }
  0xdc   : > { %s6919_s11 = sshll.u32 %s5635_s16, 10  ;;  %s6920_s5 = sshll.u32 %s5863_s22, 6 }
  0xdd   : > { %s5990_s28 = scalar_lea.hbm %s6850_s0, %s6919_s11  ;;  %s387_s23 = scalar_lea.vmem [#allocation2], %s6920_s5 }
  0xde   : > { %s394_s30 = sshll.u32 %s387_s23, 4  ;;  %s4448_s29 = sshll.u32 %s5863_s22, 1  ;;  %s5994_s30 = int_to_ptr.vmem [resolvable:$true] %s394_s30 }
  0xdf   : > { %s384_s4 = scalar_lea.sflag [#allocation3], %s5863_s22  ;;  %s5455_s10 = scalar_lea.hbm %s5990_s28, 1024 }
  0xe0   : > { %p5456_p3 = scmp.ne.s32.totalorder %s5990_s28, %s5455_s10  ;;  %p6921_p1 = scmp.ne.s32.totalorder %s6914_s12, 0 }
  0xe1   : > { %s5460_s18 = scalar_lea.hbm %s6850_s0, 2048  ;;  %p5461_p0 = scmp.lt.u32.totalorder %s5990_s28, %s6850_s0 }
  0xe2   : > { %p5458_p2 = pnand %p5456_p3, %p6921_p1  ;;  %p5462_p8 = scmp.lt.u32.totalorder %s5460_s18, %s5455_s10 }
  0xe3   : > { %p5464_p11 = scmp.lt.u32.totalorder %s5455_s10, %s5990_s28 }
  0xe4   : > { %p5459_p6 = pneg %p5458_p2  ;;  %p5463_p10 = por %p5462_p8, %p5461_p0 }
  0xe6   : > { %p5465_p7 = por %p5464_p11, %p5463_p10 }
  0xe8   : > { %p5466_p4 = pnand %p5465_p7, %p5459_p6 }
  0xea   : > { %5469 = shalt.err (!%p5466_p4)
}
  0xeb   : > { %s5470_s27 = scalar_lea.vmem %s5994_s30, 1024  ;;  %s5648_s11 = smov [#allocation2]  }
  0xec   : > { %p5471_p13 = scmp.ne.s32.totalorder %s5994_s30, %s5470_s27  ;;  %s5475_s13 = sshll.u32 %s5648_s11, 4  ;;  %s5476_s13 = int_to_ptr.vmem [resolvable:$false] %s5475_s13 }
  0xed   : > { %s5477_s19 = scalar_lea.vmem %s5476_s13, 2048  ;;  %p5478_p12 = scmp.lt.s32.totalorder %s5994_s30, %s5476_s13 }
  0xee   : > { %p5473_p5 = pnand %p5471_p13, %p6921_p1  ;;  %p5479_p3 = scmp.lt.s32.totalorder %s5477_s19, %s5470_s27 }
  0xf0   : > { %p5474_p9 = pneg %p5473_p5  ;;  %p5480_p2 = por %p5479_p3, %p5478_p12 }
  0xf2   : > { %p5481_p0 = pnand %p5480_p2, %p5474_p9 }
  0xf4   : > { %5484 = shalt.err (!%p5481_p0)
}
  0xf5   : > { %p6922_p6 = scmp.ne.s32.totalorder %s6912_s21, 0  ;;  %s6923_s5 = smov 256  }
  0xf6   : > { %s4472_s23 = sshll.u32 %s5635_s16, 5  ;;  %s429_s18 = scalar_lea.vmem [#allocation7], %s4448_s29 }
  0xf7   : > { %5120 = dma.hbm_to_vmem [thread:$0]  (!%p6922_p6), %s5990_s28, 1024, %s5994_s30, %s384_s4, %s6923_s5, %s6923_s5, %s5644_s17  }
  0xf8   : > { %s6030_s7 = scalar_lea.hbm %s6852_s2, %s4472_s23  ;;  %s437_s26 = sshll.u32 %s429_s18, 4  ;;  %s438_s26 = int_to_ptr.vmem [resolvable:$true] %s437_s26 }
  0xf9   : > { %s5485_s15 = scalar_lea.hbm %s6030_s7, 32  ;;  %s5490_s30 = scalar_lea.hbm %s6852_s2, 64 }
  0xfa   : > { %p5486_p8 = scmp.ne.s32.totalorder %s6030_s7, %s5485_s15  ;;  %p5491_p7 = scmp.lt.u32.totalorder %s6030_s7, %s6852_s2 }
  0xfb   : > { %p5492_p4 = scmp.lt.u32.totalorder %s5490_s30, %s5485_s15  ;;  %p5494_p5 = scmp.lt.u32.totalorder %s5485_s15, %s6030_s7 }
  0xfc   : > { %p5488_p10 = pnand %p5486_p8, %p6921_p1 }
  0xfd   : > { %p5493_p13 = por %p5492_p4, %p5491_p7 }
  0xfe   : > { %p5489_p11 = pneg %p5488_p10 }
  0xff   : > { %p5495_p9 = por %p5494_p5, %p5493_p13 }
 0x101   : > { %p5496_p12 = pnand %p5495_p9, %p5489_p11 }
 0x103   : > { %5499 = shalt.err (!%p5496_p12)
}
 0x104   : > { %s5500_s11 = scalar_lea.vmem %s438_s26, 32  ;;  %s5649_s13 = smov [#allocation7]  }
 0x105   : > { %p5501_p3 = scmp.ne.s32.totalorder %s438_s26, %s5500_s11  ;;  %s5505_s19 = sshll.u32 %s5649_s13, 4  ;;  %s5506_s19 = int_to_ptr.vmem [resolvable:$false] %s5505_s19 }
 0x106   : > { %s5507_s5 = scalar_lea.vmem %s5506_s19, 64  ;;  %p5508_p8 = scmp.lt.s32.totalorder %s438_s26, %s5506_s19 }
 0x107   : > { %p5503_p2 = pnand %p5501_p3, %p6921_p1  ;;  %p5509_p10 = scmp.lt.s32.totalorder %s5507_s5, %s5500_s11 }
 0x109   : > { %p5504_p0 = pneg %p5503_p2  ;;  %p5510_p6 = por %p5509_p10, %p5508_p8 }
 0x10b   : > { %p5511_p4 = pnand %p5510_p6, %p5504_p0 }
 0x10d   : > { %5514 = shalt.err (!%p5511_p4)
}
 0x10e   : > { %p6924_p7 = scmp.ne.s32.totalorder %s6912_s21, 0  ;;  %s6057_s18 = scalar_lea.hbm %s6853_s3, %s4472_s23 }
 0x10f   : > { %s448_s15 = scalar_lea.vmem [#allocation8], %s4448_s29  ;;  %s6925_s28 = sand.u32 1, %s5635_s16  }
 0x110   : > { %5126 = dma.hbm_to_vmem [thread:$0]  (!%p6924_p7), %s6030_s7, 32, %s438_s26, %s5889_s24  }
 0x111   : > { %s456_s17 = sshll.u32 %s448_s15, 4  ;;  %s445_s30 = scalar_lea.sflag [#allocation9], %s6925_s28  ;;  %s457_s17 = int_to_ptr.vmem [resolvable:$true] %s456_s17 }
 0x112   : > { %s5515_s4 = scalar_lea.hbm %s6057_s18, 32  ;;  %s5520_s23 = scalar_lea.hbm %s6853_s3, 64 }
 0x113   : > { %p5516_p6 = scmp.ne.s32.totalorder %s6057_s18, %s5515_s4  ;;  %p5521_p5 = scmp.lt.u32.totalorder %s6057_s18, %s6853_s3 }
 0x114   : > { %p5522_p9 = scmp.lt.u32.totalorder %s5520_s23, %s5515_s4  ;;  %p5524_p3 = scmp.lt.u32.totalorder %s5515_s4, %s6057_s18 }
 0x115   : > { %p5518_p11 = pnand %p5516_p6, %p6921_p1 }
 0x116   : > { %p5523_p12 = por %p5522_p9, %p5521_p5 }
 0x117   : > { %p5519_p13 = pneg %p5518_p11 }
 0x118   : > { %p5525_p2 = por %p5524_p3, %p5523_p12 }
 0x11a   : > { %p5526_p0 = pnand %p5525_p2, %p5519_p13 }
 0x11c   : > { %5529 = shalt.err (!%p5526_p0)
}
 0x11d   : > { %s5530_s29 = scalar_lea.vmem %s457_s17, 32  ;;  %s5650_s27 = smov [#allocation8]  }
 0x11e   : > { %p5531_p8 = scmp.ne.s32.totalorder %s457_s17, %s5530_s29  ;;  %s5535_s11 = sshll.u32 %s5650_s27, 4  ;;  %s5536_s11 = int_to_ptr.vmem [resolvable:$false] %s5535_s11 }
 0x11f   : > { %s5537_s13 = scalar_lea.vmem %s5536_s11, 64  ;;  %p5538_p6 = scmp.lt.s32.totalorder %s457_s17, %s5536_s11 }
 0x120   : > { %p5533_p10 = pnand %p5531_p8, %p6921_p1  ;;  %p5539_p11 = scmp.lt.s32.totalorder %s5537_s13, %s5530_s29 }
 0x122   : > { %p5534_p4 = pneg %p5533_p10  ;;  %p5540_p7 = por %p5539_p11, %p5538_p6 }
 0x124   : > { %p5541_p5 = pnand %p5540_p7, %p5534_p4 }
 0x126   : > { %5544 = shalt.err (!%p5541_p5)
}
 0x127   : > { %p6926_p9 = scmp.ne.s32.totalorder %s6912_s21, 0  ;;  %p6927_p13 = scmp.ne.s32.totalorder %s6899_s20, 0 }
 0x128   : > { %s6083_s12 = sand.u32 (!%p6927_p13), 1, %s5627_s14   ;;  %p6928_p1 = scmp.ne.s32.totalorder (!%p6927_p13), %s6907_s25, 0 }
 0x129   : > { %5129 = dma.hbm_to_vmem [thread:$0]  (!%p6926_p9), %s6057_s18, 32, %s457_s17, %s445_s30  }
 0x12a   : > { %465 = sbr.rel (%p6927_p13) target bundleno = 2771 (0xad3), region = 60  ;;  %s4455_s19 = sshll.u32 (!%p6927_p13), %s6083_s12, 6 }
 0x12b   : > { %s468_s5 = scalar_lea.sflag (!%p6927_p13), [#allocation3], %s6083_s12  ;;  %s6087_s10 = scalar_lea.vmem (!%p6927_p13), [#allocation2], %s4455_s19 }
 0x131   : > { %5590 = dma.done.wait (%p6928_p1), %s468_s5, 1024  }
 0x132   : > { %5592 = vsyncadd (%p6928_p1), %s468_s5, 4294966272  ;;  %s6929_s21 = sld [smem:[#allocation30_spill]]  ;;  %s6094_s18 = scalar_lea.vmem [#allocation5], %s4455_s19 }
 0x138   : > { %s476_s1 = sand.u32 1, %s6929_s21  }
 0x139   : > { %s477_s20 = scalar_lea.sflag [#allocation6], %s476_s1 }
 0x13a   : > { %5594 = dma.done.wait (%p6928_p1), %s477_s20, 1056  }
 0x13b   : > { %5596 = vsyncadd (%p6928_p1), %s477_s20, 4294966240  ;;  %s4457_s15 = sshll.u32 %s6083_s12, 1  ;;  %s495_s28 = scalar_lea.sflag [#allocation9], %s476_s1 }
 0x13c   : > { %s6101_s17 = scalar_lea.vmem [#allocation7], %s4457_s15  ;;  %s6103_s30 = scalar_lea.vmem [#allocation8], %s4457_s15 }
 0x13d   : > { %5598 = dma.done.wait (%p6928_p1), %s495_s28, 32  }
 0x13e   : > { %5600 = vsyncadd (%p6928_p1), %s495_s28, 4294967264  ;;  %p6930_p7 = scmp.eq.s32.totalorder %s6929_s21, 0 }
 0x140   : > { %5602 = dma.done.wait (%p6930_p7), [#allocation9], 16   ;;  %p6931_p12 = pmov %p6930_p7 }
 0x141   : > { %p6932_p3 = pmov %p6930_p7 }
 0x142   : > { %5604 = vsyncadd (%p6931_p12), [#allocation9], 4294967280 }
 0x143   : > { %5606 = dma.done.wait (%p6932_p3), [#allocation12], 528   ;;  %p6933_p2 = pmov %p6932_p3 }
 0x145   : > { %5608 = vsyncadd (%p6933_p2), [#allocation12], 4294966768  ;;  %p6934_p0 = pmov %p6933_p2 }
 0x147   : > { %5610 = dma.done.wait (%p6934_p0), [#allocation15], 768   ;;  %p6935_p8 = pmov %p6934_p0 }
 0x148   : > { %p6936_p10 = pmov %p6934_p0 }
 0x149   : > { %5612 = vsyncadd (%p6935_p8), [#allocation15], 4294966528 }
 0x14a   : > { %5614 = dma.done.wait (%p6936_p10), [#allocation18], 256   ;;  %p6937_p4 = pmov %p6934_p0 }
 0x14b   : > { %v5651_v0 = vmov 0.0   ;;  %v6128_v1 = vld [vmem:[%s6087_s10 + $0x8] sm:$0xff]  ;;  %v6131_v2 = vld [vmem:[%s6087_s10 + $0x18] sm:$0xff]  ;;  %v6134_v3 = vld [vmem:[%s6087_s10] sm:$0xff]  ;;  %vm943_vm0 = vcmask 261120   ;;  %vm835_vm1 = vcmask 1040384  }
 0x14c   : > { %5616 = vsyncadd (%p6937_p4), [#allocation18], 4294967040  ;;  %1019 = vmatprep.mubr.f32.mxu0 %v5651_v0  ;;  %1613 = vmatprep.mubr.f32.mxu1 %v5651_v0  ;;  %v947_v4 = vand.u32 4294901760, %v6128_v1  ;;  %v951_v5 = vand.u32 4294901760, %v6131_v2  ;;  %v6139_v6 = vld [vmem:[%s6087_s10 + $0x10] sm:$0xff]  ;;  %v949_v7 = vand.u32 4294901760, %v6134_v3 }
 0x14d   : > { %v6143_v8 = vld [vmem:[%s6087_s10 + $0x28] sm:$0xff]  ;;  %v6146_v9 = vld [vmem:[%s6087_s10 + $0x38] sm:$0xff]  ;;  %v953_v10 = vand.u32 4294901760, %v6139_v6  ;;  %v6152_v13 = vld [vmem:[%s6087_s10 + $0x20] sm:$0xff]  ;;  %vm5653_vm2 = vmmov 0   ;;  %vm2152_vm3 = vcmask 130112  }
 0x14e   : > { %v955_v11 = vand.u32 4294901760, %v6143_v8  ;;  %v959_v12 = vand.u32 4294901760, %v6146_v9  ;;  %v6155_v14 = vld [vmem:[%s6087_s10 + $0x30] sm:$0xff]  ;;  %v6157_v15 = vpack.c.bf16 %v951_v5, %v947_v4  ;;  %v6160_v16 = vsub.f32 %v6128_v1, %v947_v4  ;;  %v942_v19 = vld [vmem:[#allocation10] sm:$0x1]  ;;  %s4465_s26 = sshll.u32 %s6083_s12, 3 }
 0x14f   : > { %v6163_v17 = vsub.f32 %v6131_v2, %v951_v5  ;;  %v6166_v18 = vsub.f32 %v6134_v3, %v949_v7  ;;  %v6168_v20 = vpack.c.bf16 %v953_v10, %v949_v7  ;;  %v6171_v21 = vsub.f32 %v6139_v6, %v953_v10  ;;  %s6938_s5 = sld [smem:[#allocation33_spill]]  ;;  %s573_s1 = scalar_lea.vmem [#allocation19], %s4465_s26 }
 0x150   : > { %v6173_v22 = vpack.c.bf16 %v959_v12, %v955_v11  ;;  %v6176_v23 = vsub.f32 %v6143_v8, %v955_v11  ;;  %4787 = vmatprep.subr.bf16.mxu0 %v6157_v15  ;;  %v6180_v24 = vsub.f32 %v6146_v9, %v959_v12  ;;  %v957_v25 = vand.u32 4294901760, %v6152_v13  ;;  %s4240_s20 = sshll.u32 %s573_s1, 4  ;;  %s6808_s20 = int_to_ptr.vmem [resolvable:$true] %s4240_s20 }
 0x151   : > { %v961_v26 = vand.u32 4294901760, %v6155_v14  ;;  %v945_v27 = vsel %vm943_vm0, %v942_v19, 0  ;;  %4789 = vmatpush1.bf16.msra.mxu0 %v6168_v20  ;;  %v1033_v29 = vand.u32 4294901760, %v6160_v16  ;;  %v1045_v30 = vand.u32 4294901760, %v6163_v17  ;;  %v6233_v19 = vld [vmem:[%s6094_s18 + $0x18] sm:$0xff] }
 0x152   : > { %v6186_v28 = vand.u32 4294901760, %v945_v27  ;;  %v1039_v31 = vand.u32 4294901760, %v6166_v18  ;;  %4791 = vmatprep.subr.bf16.mxu0 %v6173_v22  ;;  %v1062_v33 = vsub.f32 %v6152_v13, %v957_v25  ;;  %v1051_v35 = vand.u32 4294901760, %v6171_v21 }
 0x153   : > { %v6192_v32 = vpack.c.bf16 %v961_v26, %v957_v25  ;;  %v1074_v34 = vsub.f32 %v6155_v14, %v961_v26  ;;  %v1034_v37 = vsub.f32 %v6160_v16, %v1033_v29  ;;  %v1046_v38 = vsub.f32 %v6163_v17, %v1045_v30  ;;  %v6248_v25 = vld [vmem:[%s6094_s18 + $0x38] sm:$0xff] }
 0x154   : > { %v1021_v36 = vsub.f32 %v945_v27, %v6186_v28  ;;  %v1040_v39 = vsub.f32 %v6166_v18, %v1039_v31  ;;  %v1052_v40 = vsub.f32 %v6171_v21, %v1051_v35  ;;  %v1057_v41 = vand.u32 4294901760, %v6176_v23 }
 0x155   : > { %v1069_v42 = vand.u32 4294901760, %v6180_v24  ;;  %v1063_v43 = vand.u32 4294901760, %v1062_v33  ;;  %4793 = vmatpush1.bf16.msra.mxu0 %v6192_v32  ;;  %v1035_v45 = vand.u32 4294901760, %v1034_v37  ;;  %v1047_v46 = vand.u32 4294901760, %v1046_v38  ;;  %p6940_p11 = scmp.ne.s32.totalorder %s6938_s5, 0 }
 0x156   : > { %v1022_v44 = vand.u32 4294901760, %v1021_v36  ;;  %v1041_v47 = vand.u32 4294901760, %v1040_v39  ;;  %v1053_v48 = vand.u32 4294901760, %v1052_v40  ;;  %v1058_v49 = vsub.f32 %v6176_v23, %v1057_v41 }
 0x157   : > { %v1070_v50 = vsub.f32 %v6180_v24, %v1069_v42  ;;  %v1064_v51 = vsub.f32 %v1062_v33, %v1063_v43  ;;  %v4794_v53 = vpack.c.bf16 %v1047_v46, %v1035_v45  ;;  %v1075_v54 = vand.u32 4294901760, %v1074_v34 }
 0x158   : > { %v1023_v52 = vsub.f32 %v1021_v36, %v1022_v44  ;;  %v4796_v55 = vpack.c.bf16 %v1053_v48, %v1041_v47  ;;  %v1059_v56 = vand.u32 4294901760, %v1058_v49  ;;  %v4802_v4 = vpack.c.bf16 %v6163_v17, %v6160_v16 }
 0x159   : > { %v1071_v57 = vand.u32 4294901760, %v1070_v50  ;;  %4795 = vmatprep.subr.bf16.mxu0 %v4794_v53  ;;  %v1065_v59 = vand.u32 4294901760, %v1064_v51  ;;  %v1076_v60 = vsub.f32 %v1074_v34, %v1075_v54  ;;  %v4804_v5 = vpack.c.bf16 %v6171_v21, %v6166_v18  ;;  %v6230_v18 = vld [vmem:[%s6094_s18 + $0x8] sm:$0xff]  ;;  %v6236_v21 = vld [vmem:[%s6094_s18] sm:$0xff] }
 0x15a   : > { %v1024_v58 = vand.u32 4294901760, %v1023_v52  ;;  %v4806_v7 = vpack.c.bf16 %v6180_v24, %v6176_v23  ;;  %v4808_v10 = vpack.c.bf16 %v1074_v34, %v1062_v33  ;;  %v4818_v11 = vpack.c.bf16 %v1045_v30, %v1033_v29  ;;  %v6241_v23 = vld [vmem:[%s6094_s18 + $0x10] sm:$0xff]  ;;  %v6254_v29 = vld [vmem:[%s6094_s18 + $0x20] sm:$0xff] }
 0x15b   : > { %v4798_v61 = vpack.c.bf16 %v1071_v57, %v1059_v56  ;;  %v1077_v62 = vand.u32 4294901760, %v1076_v60  ;;  %v4820_v12 = vpack.c.bf16 %v1051_v35, %v1039_v31  ;;  %v4822_v16 = vpack.c.bf16 %v1069_v42, %v1057_v41  ;;  %v6257_v30 = vld [vmem:[%s6094_s18 + $0x30] sm:$0xff]  ;;  %v1537_v35 = vld [vmem:[#allocation11] sm:$0x1] }
 0x15c   : > { %1025 = vmatmul.mubr.f32.vlgmr.msra.gmra.mrb[0].mxu0 %v1024_v58  ;;  %v4824_v17 = vpack.c.bf16 %v1075_v54, %v1063_v43  ;;  %v1543_v24 = vand.u32 4294901760, %v6236_v21  ;;  %v1547_v26 = vand.u32 4294901760, %v6241_v23  ;;  %v1551_v41 = vand.u32 4294901760, %v6254_v29 }
 0x15d   : > { %4797 = vmatpush1.bf16.msra.mxu0 %v4796_v55  ;;  %1135 = vmatprep.mubr.f32.mxu0 %v5651_v0  ;;  %v4800_v63 = vpack.c.bf16 %v1077_v62, %v1065_v59  ;;  %v1555_v42 = vand.u32 4294901760, %v6257_v30  ;;  %v1539_v43 = vsel %vm943_vm0, %v1537_v35, 0  ;;  %vm2159_vm4 = vcmask 195712  }
 0x15e   : > { %4799 = vmatprep.subr.bf16.mxu0 %v4798_v61  ;;  %v6268_v34 = vsub.f32 %v6236_v21, %v1543_v24  ;;  %v6273_v37 = vsub.f32 %v6241_v23, %v1547_v26  ;;  %v1656_v49 = vsub.f32 %v6254_v29, %v1551_v41  ;;  %vm2166_vm5 = vcmask 261312  }
 0x15f   : > { %v6294_v48 = vpack.c.bf16 %v1555_v42, %v1551_v41  ;;  %v1668_v50 = vsub.f32 %v6257_v30, %v1555_v42  ;;  %vm2655_vm6 = vcmask 122880   ;;  %vm2671_vm7 = vcmask 130048  }
 0x160   : > { %v1633_v47 = vand.u32 4294901760, %v6268_v34  ;;  %v1645_v51 = vand.u32 4294901760, %v6273_v37  ;;  %v1657_v59 = vand.u32 4294901760, %v1656_v49  ;;  %vm814_vm8 = vcmask 7168  }
 0x161   : > { %4801 = vmatpush1.bf16.msra.mxu0 %v4800_v63  ;;  %vm4180_vm9 = vcmask 253952  }
 0x162   : > { %4803 = vmatprep.subr.bf16.mxu0 %v4802_v4  ;;  %v1634_v55 = vsub.f32 %v6268_v34, %v1633_v47  ;;  %v1646_v56 = vsub.f32 %v6273_v37, %v1645_v51 }
 0x164   : > { %1137 = vmatmul.mubr.f32.vlgmr.msra.gmra.mrb[0].mxu0 %v6186_v28  ;;  %v1635_v63 = vand.u32 4294901760, %v1634_v55  ;;  %v1647_v4 = vand.u32 4294901760, %v1646_v56 }
 0x165   : > { %4805 = vmatpush1.bf16.msra.mxu0 %v4804_v5  ;;  %1223 = vmatprep.mubr.f32.mxu0 %v5651_v0 }
 0x166   : > { %4807 = vmatprep.subr.bf16.mxu0 %v4806_v7 }
 0x169   : > { %4809 = vmatpush1.bf16.msra.mxu0 %v4808_v10  ;;  %v1658_v10 = vsub.f32 %v1656_v49, %v1657_v59 }
 0x16a   : > { %4811 = vmatprep.subr.bf16.mxu0 %v6157_v15 }
 0x16c   : > { %1226 = vmatmul.mubr.f32.vlgmr.msra.gmra.mrb[0].mxu0 %v1021_v36  ;;  %v6270_v36 = vpack.c.bf16 %v1547_v26, %v1543_v24  ;;  %v1659_v26 = vand.u32 4294901760, %v1658_v10 }
 0x16d   : > { %4813 = vmatpush1.bf16.msra.mxu0 %v6168_v20  ;;  %1304 = vmatprep.mubr.f32.mxu0 %v5651_v0 }
 0x16e   : > { %4815 = vmatprep.subr.bf16.mxu0 %v6173_v22 }
 0x171   : > { %4817 = vmatpush1.bf16.msra.mxu0 %v6192_v32 }
 0x172   : > { %4819 = vmatprep.subr.bf16.mxu0 %v4818_v11 }
 0x174   : > { %1308 = vmatmul.mubr.f32.vlgmr.msra.gmra.mrb[0].mxu0 %v1022_v44  ;;  %v6288_v44 = vand.u32 4294901760, %v1539_v43 }
 0x175   : > { %4821 = vmatpush1.bf16.msra.mxu0 %v4820_v12  ;;  %1402 = vmatprep.mubr.f32.mxu0 %v5651_v0 }
 0x176   : > { %4823 = vmatprep.subr.bf16.mxu0 %v4822_v16  ;;  %v1615_v52 = vsub.f32 %v1539_v43, %v6288_v44  ;;  %v1669_v16 = vand.u32 4294901760, %v1668_v50  ;;  %v4852_v43 = vpack.c.bf16 %v6273_v37, %v6268_v34 }
 0x178   : > { %v1616_v60 = vand.u32 4294901760, %v1615_v52  ;;  %v4872_v37 = vpack.c.bf16 %v1669_v16, %v1657_v59 }
 0x179   : > { %4825 = vmatpush1.bf16.msra.mxu0 %v4824_v17  ;;  %v4844_v17 = vpack.c.bf16 %v1647_v4, %v1635_v63 }
 0x17a   : > { %4827 = vmatprep.subr.bf16.mxu0 %v6157_v15  ;;  %v1541_v15 = vand.u32 4294901760, %v6230_v18  ;;  %v1617_v11 = vsub.f32 %v1615_v52, %v1616_v60 }
 0x17c   : > { %1404 = vmatmul.mubr.f32.vlgmr.msra.gmra.mrb[0].mxu0 %v6186_v28  ;;  %v1618_v24 = vand.u32 4294901760, %v1617_v11 }
 0x17d   : > { %4829 = vmatpush1.bf16.msra.mxu0 %v6168_v20  ;;  %1482 = vmatprep.mubr.f32.mxu0 %v5651_v0  ;;  %v1545_v20 = vand.u32 4294901760, %v6233_v19 }
 0x17e   : > { %4831 = vmatprep.subr.bf16.mxu0 %v6173_v22  ;;  %v6245_v22 = vld [vmem:[%s6094_s18 + $0x28] sm:$0xff] }
 0x17f   : > { %v1549_v27 = vand.u32 4294901760, %v6245_v22  ;;  %v6259_v31 = vpack.c.bf16 %v1545_v20, %v1541_v15  ;;  %v6265_v33 = vsub.f32 %v6233_v19, %v1545_v20 }
 0x181   : > { %4833 = vmatpush1.bf16.msra.mxu0 %v6192_v32  ;;  %v6262_v32 = vsub.f32 %v6230_v18, %v1541_v15  ;;  %v6278_v39 = vsub.f32 %v6245_v22, %v1549_v27  ;;  %4835 = vmatprep.subr.bf16.mxu1 %v6259_v31  ;;  %v1639_v46 = vand.u32 4294901760, %v6265_v33 }
 0x182   : > { %4837 = vmatpush1.bf16.msra.mxu1 %v6270_v36 }
 0x183   : > { %v1627_v45 = vand.u32 4294901760, %v6262_v32  ;;  %v1640_v54 = vsub.f32 %v6265_v33, %v1639_v46  ;;  %v1651_v57 = vand.u32 4294901760, %v6278_v39  ;;  %v4850_v42 = vpack.c.bf16 %v6265_v33, %v6262_v32 }
 0x184   : > { %1484 = vmatmul.mubr.f32.vlgmr.msra.gmra.mrb[0].mxu0 %v6186_v28  ;;  %v1553_v28 = vand.u32 4294901760, %v6248_v25  ;;  %v4868_v33 = vpack.c.bf16 %v1645_v51, %v1633_v47 }
 0x185   : > { %v1628_v53 = vsub.f32 %v6262_v32, %v1627_v45  ;;  %v1641_v62 = vand.u32 4294901760, %v1640_v54  ;;  %v1652_v5 = vsub.f32 %v6278_v39, %v1651_v57  ;;  %v4856_v54 = vpack.c.bf16 %v1668_v50, %v1656_v49  ;;  %4578 = vmatprep.mubr.msk.f32.mxu0 %vm5653_vm2, %v5651_v0 }
 0x186   : > { %v6275_v38 = vpack.c.bf16 %v1553_v28, %v1549_v27  ;;  %v6282_v40 = vsub.f32 %v6248_v25, %v1553_v28  ;;  %v1670_v27 = vsub.f32 %v1668_v50, %v1669_v16  ;;  %v4866_v32 = vpack.c.bf16 %v1639_v46, %v1627_v45 }
 0x187   : > { %v1629_v61 = vand.u32 4294901760, %v1628_v53  ;;  %v1653_v15 = vand.u32 4294901760, %v1652_v5 }
 0x188   : > { %4839 = vmatprep.subr.bf16.mxu1 %v6275_v38  ;;  %v1663_v58 = vand.u32 4294901760, %v6282_v40  ;;  %v1671_v35 = vand.u32 4294901760, %v1670_v27  ;;  %v4854_v53 = vpack.c.bf16 %v6282_v40, %v6278_v39 }
 0x189   : > { %4841 = vmatpush1.bf16.msra.mxu1 %v6294_v48  ;;  %v4842_v12 = vpack.c.bf16 %v1641_v62, %v1629_v61  ;;  %v893_v62 = vlaneseq }
 0x18a   : > { %v1664_v7 = vsub.f32 %v6282_v40, %v1663_v58  ;;  %v4848_v41 = vpack.c.bf16 %v1671_v35, %v1659_v26  ;;  %v4870_v34 = vpack.c.bf16 %v1663_v58, %v1651_v57 }
 0x18b   : > { %4843 = vmatprep.subr.bf16.mxu1 %v4842_v12  ;;  %v6344_v63 = vshrl.u32 %v893_v62, 7 }
 0x18c   : > { %v1665_v20 = vand.u32 4294901760, %v1664_v7  ;;  %1619 = vmatmul.mubr.f32.vlgmr.msra.gmra.mrb[0].mxu1 %v1618_v24 }
 0x18d   : > { %4845 = vmatpush1.bf16.msra.mxu1 %v4844_v17  ;;  %1729 = vmatprep.mubr.f32.mxu1 %v5651_v0  ;;  %v6347_v4 = vsub.s32 0, %v6344_v63 }
 0x18e   : > { %v4846_v28 = vpack.c.bf16 %v1665_v20, %v1653_v15 }
 0x190   : > { %4847 = vmatprep.subr.bf16.mxu1 %v4846_v28 }
 0x191   : > { %4849 = vmatpush1.bf16.msra.mxu1 %v4848_v41 }
 0x192   : > { %4851 = vmatprep.subr.bf16.mxu1 %v4850_v42 }
 0x194   : > { %1731 = vmatmul.mubr.f32.vlgmr.msra.gmra.mrb[0].mxu1 %v6288_v44 }
 0x195   : > { %4853 = vmatpush1.bf16.msra.mxu1 %v4852_v43  ;;  %1817 = vmatprep.mubr.f32.mxu1 %v5651_v0 }
 0x196   : > { %4855 = vmatprep.subr.bf16.mxu1 %v4854_v53 }
 0x199   : > { %4857 = vmatpush1.bf16.msra.mxu1 %v4856_v54  ;;  %v2133_v54 = vld [vmem:[#allocation13 + $0x10] sm:$0xff] }
 0x19a   : > { %4859 = vmatprep.subr.bf16.mxu1 %v6259_v31 }
 0x19c   : > { %1820 = vmatmul.mubr.f32.vlgmr.msra.gmra.mrb[0].mxu1 %v1615_v52 }
 0x19d   : > { %4861 = vmatpush1.bf16.msra.mxu1 %v6270_v36  ;;  %1898 = vmatprep.mubr.f32.mxu1 %v5651_v0 }
 0x19e   : > { %4863 = vmatprep.subr.bf16.mxu1 %v6275_v38 }
 0x1a1   : > { %4865 = vmatpush1.bf16.msra.mxu1 %v6294_v48 }
 0x1a2   : > { %4867 = vmatprep.subr.bf16.mxu1 %v4866_v32  ;;  %v2134_v32 = vld [vmem:[#allocation13 + $0x18] sm:$0xff] }
 0x1a4   : > { %1902 = vmatmul.mubr.f32.vlgmr.msra.gmra.mrb[0].mxu1 %v1616_v60 }
 0x1a5   : > { %4869 = vmatpush1.bf16.msra.mxu1 %v4868_v33  ;;  %1996 = vmatprep.mubr.f32.mxu1 %v5651_v0  ;;  %v5652_v33 = vmov 0.0|0.0  }
 0x1a6   : > { %4871 = vmatprep.subr.bf16.mxu1 %v4870_v34  ;;  %4882 = vmatprep.subr.bf16.mxu0 %v5652_v33 }
 0x1a9   : > { %4873 = vmatpush1.bf16.msra.mxu1 %v4872_v37 }
 0x1aa   : > { %4875 = vmatprep.subr.bf16.mxu1 %v6259_v31 }
 0x1ac   : > { %1998 = vmatmul.mubr.f32.vlgmr.msra.gmra.mrb[0].mxu1 %v6288_v44 }
 0x1ad   : > { %4877 = vmatpush1.bf16.msra.mxu1 %v6270_v36  ;;  %2076 = vmatprep.mubr.f32.mxu1 %v5651_v0 }
 0x1ae   : > { %4879 = vmatprep.subr.bf16.mxu1 %v6275_v38 }
 0x1b1   : > { %4881 = vmatpush1.bf16.msra.mxu1 %v6294_v48 }
 0x1b2   : > { %4918 = vmatprep.subr.bf16.mxu1 %v5652_v33 }
 0x1b4   : > { %2078 = vmatmul.mubr.f32.vlgmr.msra.gmra.mrb[0].mxu1 %v6288_v44 }
 0x1b5   : > { %4640 = vmatprep.mubr.msk.f32.mxu1 %vm5653_vm2, %v5651_v0 }
 0x257   : > { %v1485_v39 = vpop.f32.mrb[0].mxu0 }
 0x258   : > { %v1487_v40 = vpop.f32.mrb[1].mxu0  ;;  %v1490_v45 = vsel %vm835_vm1, %v1485_v39, -inf }
 0x259   : > { %v1491_v46 = vsel %vm835_vm1, %v1487_v40, -inf }
 0x25a   : > { %v1492_v31 = vmax.f32 %v1490_v45, %v1491_v46 }
 0x25c   : > { %1493 = vmax.xlane.f32.xlu0 %v1492_v31 }
 0x287   : > { %v6335_v56 = vpop.f32.mrb[0].mxu1 }
 0x288   : > { %v6337_v57 = vpop.f32.mrb[1].mxu1  ;;  %v2084_v58 = vsel %vm835_vm1, %v6335_v56, -inf }
 0x289   : > { %v2085_v59 = vsel %vm835_vm1, %v6337_v57, -inf }
 0x28a   : > { %v2086_v60 = vmax.f32 %v2084_v58, %v2085_v59 }
 0x2e9   : > { %v1494_v47 = vpop.xlane.xlu0 %1493 }
 0x2ea   : > { %v1495_v49 = vsub.f32 %v1485_v39, %v1494_v47  ;;  %v1496_v36 = vsub.f32 %v1487_v40, %v1494_v47 }
 0x2ec   : > { %v1497_v50 = vmul.f32 1.442695, %v1495_v49  ;;  %v1499_v51 = vmul.f32 1.442695, %v1496_v36 }
 0x2ee   : > { %5193 = vpow2.f32 %v1497_v50 }
 0x2ef   : > { %5195 = vpow2.f32 %v1499_v51 }
 0x2f8   : > { %v5194_v38 = vpop.eup %5193 }
 0x2f9   : > { %v5196_v48 = vpop.eup %5195  ;;  %v1501_v44 = vsel %vm835_vm1, %v5194_v38, 0.0 }
 0x2fa   : > { %v1502_v52 = vsel %vm835_vm1, %v5196_v48, 0.0 }
 0x2fb   : > { %v1503_v55 = vadd.f32 %v1502_v52, %v1501_v44 }
 0x2fd   : > { %1504 = vadd.xlane.f32.xlu0 %v1503_v55 }
 0x38a   : > { %v1505_v61 = vpop.xlane.xlu0 %1504 }
 0x38b   : > { %5197 = vrcp.f32 %v1505_v61 }
 0x395   : > { %v5198_v5 = vpop.eup %5197 }
 0x396   : > { %v1507_v7 = vmul.f32 %v5198_v5, %v5194_v38  ;;  %v1508_v10 = vmul.f32 %v5198_v5, %v5196_v48  ;;  %v6396_v5 = vand.u32 127, %v893_v62 }
 0x398   : > { %v1512_v11 = vrot.slane %v1507_v7, %v6347_v4  ;;  %v1516_v12 = vrot.slane %v1508_v10, %v6347_v4  ;;  %v2147_v7 = vadd.s32 4294967288, %v6396_v5  ;;  %v2154_v10 = vadd.s32 4294967280, %v6396_v5 }
 0x399   : > { %vm4209_vm10 = vcmp.eq.s32.totalorder %v6396_v5, 1  ;;  %vm4206_vm11 = vcmp.eq.s32.totalorder %v6396_v5, 0  ;;  %vm4213_vm12 = vcmp.eq.s32.totalorder %v6396_v5, 2  ;;  %vm4217_vm13 = vcmp.eq.s32.totalorder %v6396_v5, 3 }
 0x39a   : > { %v1521_v16 = vmul.f32 %v1512_v11, %v6152_v13  ;;  %v1522_v17 = vmul.f32 %v1516_v12, %v6143_v8  ;;  %v1517_v15 = vmul.f32 %v1512_v11, %v6134_v3  ;;  %v1518_v20 = vmul.f32 %v1516_v12, %v6128_v1  ;;  %v2131_v3 = vld [vmem:[#allocation13] sm:$0xff]  ;;  %v2132_v13 = vld [vmem:[#allocation13 + $0x8] sm:$0xff] }
 0x39b   : > { %v1519_v27 = vmul.f32 %v1512_v11, %v6139_v6  ;;  %v1520_v28 = vmul.f32 %v1516_v12, %v6131_v2  ;;  %v1523_v41 = vmul.f32 %v1512_v11, %v6155_v14  ;;  %v1524_v42 = vmul.f32 %v1516_v12, %v6146_v9 }
 0x39c   : > { %v1531_v24 = vadd.f32 %v1522_v17, %v1521_v16  ;;  %v1525_v26 = vadd.f32 %v1518_v20, %v1517_v15  ;;  %v2171_v1 = vand.u32 4294901760, %v2131_v3  ;;  %v2174_v43 = vand.u32 4294901760, %v2132_v13 }
 0x39d   : > { %v1528_v35 = vadd.f32 %v1520_v28, %v1519_v27  ;;  %v1534_v8 = vadd.f32 %v1524_v42, %v1523_v41  ;;  %v2177_v9 = vand.u32 4294901760, %v2133_v54  ;;  %v2180_v14 = vand.u32 4294901760, %v2134_v32 }
 0x39e   : > { %1532 = vadd.xlane.f32.xlu0 %v1531_v24  ;;  %1526 = vadd.xlane.f32.xlu1 %v1525_v26  ;;  %v6359_v53 = vpack.c.bf16 %v2174_v43, %v2171_v1  ;;  %v6361_v6 = vsub.f32 %v2131_v3, %v2171_v1  ;;  %v6363_v2 = vsub.f32 %v2132_v13, %v2174_v43  ;;  %v2161_v16 = vadd.s32 4294967272, %v6396_v5 }
 0x39f   : > { %v6373_v39 = vpack.c.bf16 %v2180_v14, %v2177_v9  ;;  %v6375_v40 = vsub.f32 %v2133_v54, %v2177_v9  ;;  %v6377_v45 = vsub.f32 %v2134_v32, %v2180_v14  ;;  %v6403_v17 = vsub.s32 %v6396_v5, %v6344_v63 }
 0x3a0   : > { %4884 = vmatpush3.bf16.msra.mxu0 %v6359_v53  ;;  %v2252_v34 = vand.u32 4294901760, %v6361_v6  ;;  %v2259_v37 = vand.u32 4294901760, %v6363_v2  ;;  %v4895_v58 = vpack.c.bf16 %v6363_v2, %v6361_v6  ;;  %v6406_v15 = vsub.s32 %v2147_v7, %v6344_v63 }
 0x3a1   : > { %4885 = vmatprep.subr.bf16.mxu0 %v5652_v33  ;;  %v2266_v36 = vand.u32 4294901760, %v6375_v40  ;;  %v2273_v50 = vand.u32 4294901760, %v6377_v45  ;;  %v4898_v59 = vpack.c.bf16 %v6377_v45, %v6375_v40  ;;  %v6409_v20 = vsub.s32 %v2154_v10, %v6344_v63 }
 0x3a2   : > { %2087 = vmax.xlane.f32.xlu0 %v2086_v60  ;;  %1529 = vadd.xlane.f32.xlu1 %v1528_v35  ;;  %v2253_v46 = vsub.f32 %v6361_v6, %v2252_v34  ;;  %v2260_v31 = vsub.f32 %v6363_v2, %v2259_v37  ;;  %v4907_v60 = vpack.c.bf16 %v2259_v37, %v2252_v34  ;;  %vm4221_vm14 = vcmp.eq.s32.totalorder %v6396_v5, 4 }
 0x3a3   : > { %v2267_v38 = vsub.f32 %v6375_v40, %v2266_v36  ;;  %v2274_v48 = vsub.f32 %v6377_v45, %v2273_v50  ;;  %v6393_v61 = vpack.c.bf16 %v2273_v50, %v2266_v36  ;;  %v6412_v26 = vsub.s32 %v2161_v16, %v6344_v63 }
 0x3a4   : > { %4887 = vmatpush3.bf16.msra.mxu0 %v6373_v39  ;;  %v2254_v47 = vand.u32 4294901760, %v2253_v46  ;;  %v2261_v49 = vand.u32 4294901760, %v2260_v31 }
 0x3a5   : > { %4888 = vmatprep.subr.bf16.mxu0 %v5652_v33  ;;  %v2268_v44 = vand.u32 4294901760, %v2267_v38  ;;  %v2275_v52 = vand.u32 4294901760, %v2274_v48 }
 0x3a6   : > { %1535 = vadd.xlane.f32.xlu1 %v1534_v8  ;;  %v4889_v51 = vpack.c.bf16 %v2261_v49, %v2254_v47 }
 0x3a7   : > { %v4892_v55 = vpack.c.bf16 %v2275_v52, %v2268_v44 }
 0x42b   : > { %v1533_v11 = vpop.xlane.xlu0 %1532  ;;  %v1527_v12 = vpop.xlane.xlu1 %1526 }
 0x42c   : > { %v2146_v27 = vrot.slane %v1527_v12, %v6403_v17  ;;  %v2158_v13 = vrot.slane %v1533_v11, %v6409_v20 }
 0x42f   : > { %v2088_v62 = vpop.xlane.xlu0 %2087  ;;  %v1530_v24 = vpop.xlane.xlu1 %1529 }
 0x430   : > { %v2089_v28 = vsub.f32 %v6335_v56, %v2088_v62  ;;  %v2090_v35 = vsub.f32 %v6337_v57, %v2088_v62  ;;  %v2151_v41 = vrot.slane %v1530_v24, %v6406_v15 }
 0x432   : > { %v2091_v42 = vmul.f32 1.442695, %v2089_v28  ;;  %v2093_v8 = vmul.f32 1.442695, %v2090_v35  ;;  %v2153_v3 = vsel %vm2152_vm3, %v2151_v41, %v2146_v27  ;;  %v2135_v35 = vld [vmem:[#allocation14] sm:$0xff]  ;;  %v2136_v41 = vld [vmem:[#allocation14 + $0x8] sm:$0xff] }
 0x433   : > { %v1536_v1 = vpop.xlane.xlu1 %1535  ;;  %v2160_v6 = vsel %vm2159_vm4, %v2158_v13, %v2153_v3 }
 0x434   : > { %5199 = vpow2.f32 %v2091_v42  ;;  %v2165_v43 = vrot.slane %v1536_v1, %v6412_v26  ;;  %v2676_v42 = vand.u32 4294901760, %v2135_v35 }
 0x435   : > { %5201 = vpow2.f32 %v2093_v8  ;;  %v2679_v8 = vand.u32 4294901760, %v2136_v41 }
 0x436   : > { %v2167_v56 = vsel %vm2166_vm5, %v2165_v43, %v2160_v6  ;;  %v2754_v13 = vsub.f32 %v2135_v35, %v2676_v42 }
 0x437   : > { %v2168_v57 = vsel %vm943_vm0, %v2167_v56, 0  ;;  %v6465_v3 = vpack.c.bf16 %v2679_v8, %v2676_v42  ;;  %v2761_v1 = vsub.f32 %v2136_v41, %v2679_v8 }
 0x438   : > { %v2239_v2 = vand.u32 4294901760, %v2168_v57  ;;  %v2755_v43 = vand.u32 4294901760, %v2754_v13 }
 0x439   : > { %4920 = vmatpush3.bf16.msra.mxu1 %v6465_v3  ;;  %v2762_v6 = vand.u32 4294901760, %v2761_v1 }
 0x43a   : > { %v2240_v54 = vsub.f32 %v2168_v57, %v2239_v2  ;;  %4921 = vmatprep.subr.bf16.mxu1 %v5652_v33  ;;  %v2756_v56 = vsub.f32 %v2754_v13, %v2755_v43 }
 0x43b   : > { %v2763_v57 = vsub.f32 %v2761_v1, %v2762_v6 }
 0x43c   : > { %v2241_v32 = vand.u32 4294901760, %v2240_v54 }
 0x43e   : > { %v5200_v9 = vpop.eup %5199  ;;  %v2242_v14 = vsub.f32 %v2240_v54, %v2241_v32 }
 0x43f   : > { %v5202_v34 = vpop.eup %5201  ;;  %v2095_v37 = vsel %vm835_vm1, %v5200_v9, 0.0 }
 0x440   : > { %v2096_v40 = vsel %vm835_vm1, %v5202_v34, 0.0  ;;  %v2243_v45 = vand.u32 4294901760, %v2242_v14  ;;  %v4931_v14 = vpack.c.bf16 %v2762_v6, %v2755_v43 }
 0x441   : > { %v2097_v46 = vadd.f32 %v2096_v40, %v2095_v37 }
 0x442   : > { %4579 = vmatmul.mubr.f32.vlgmr.msra.gmra.mrb[2].mxu0 %v2243_v45 }
 0x443   : > { %2098 = vadd.xlane.f32.xlu0 %v2097_v46  ;;  %4890 = vmatpush3.bf16.msra.mxu0 %v4889_v51 }
 0x444   : > { %4891 = vmatprep.subr.bf16.mxu0 %v5652_v33  ;;  %4589 = vmatprep.mubr.msk.f32.mxu0 %vm5653_vm2, %v5651_v0 }
 0x447   : > { %4893 = vmatpush3.bf16.msra.mxu0 %v4892_v55 }
 0x448   : > { %4894 = vmatprep.subr.bf16.mxu0 %v5652_v33 }
 0x44a   : > { %4590 = vmatmul.mubr.f32.vlgmr.msra.gmra.mrb[2].mxu0 %v2239_v2 }
 0x44b   : > { %4896 = vmatpush3.bf16.msra.mxu0 %v4895_v58  ;;  %4600 = vmatprep.mubr.msk.f32.mxu0 %vm5653_vm2, %v5651_v0 }
 0x44c   : > { %4897 = vmatprep.subr.bf16.mxu0 %v5652_v33 }
 0x44f   : > { %4899 = vmatpush3.bf16.msra.mxu0 %v4898_v59 }
 0x450   : > { %4900 = vmatprep.subr.bf16.mxu0 %v5652_v33 }
 0x452   : > { %4601 = vmatmul.mubr.f32.vlgmr.msra.gmra.mrb[2].mxu0 %v2240_v54  ;;  %v2764_v54 = vand.u32 4294901760, %v2763_v57 }
 0x453   : > { %4902 = vmatpush3.bf16.msra.mxu0 %v6359_v53  ;;  %4611 = vmatprep.mubr.msk.f32.mxu0 %vm5653_vm2, %v5651_v0 }
 0x454   : > { %4903 = vmatprep.subr.bf16.mxu0 %v5652_v33 }
 0x457   : > { %4905 = vmatpush3.bf16.msra.mxu0 %v6373_v39 }
 0x458   : > { %4906 = vmatprep.subr.bf16.mxu0 %v5652_v33 }
 0x45a   : > { %4612 = vmatmul.mubr.f32.vlgmr.msra.gmra.mrb[2].mxu0 %v2241_v32 }
 0x45b   : > { %4908 = vmatpush3.bf16.msra.mxu0 %v4907_v60  ;;  %4622 = vmatprep.mubr.msk.f32.mxu0 %vm5653_vm2, %v5651_v0 }
 0x45c   : > { %4909 = vmatprep.subr.bf16.mxu0 %v5652_v33 }
 0x45f   : > { %4911 = vmatpush3.bf16.msra.mxu0 %v6393_v61 }
 0x460   : > { %4912 = vmatprep.subr.bf16.mxu0 %v5652_v33 }
 0x462   : > { %4623 = vmatmul.mubr.f32.vlgmr.msra.gmra.mrb[2].mxu0 %v2239_v2 }
 0x463   : > { %4914 = vmatpush3.bf16.msra.mxu0 %v6359_v53  ;;  %4633 = vmatprep.mubr.msk.f32.mxu0 %vm5653_vm2, %v5651_v0 }
 0x464   : > { %4915 = vmatprep.subr.bf16.mxu0 %v5652_v33 }
 0x467   : > { %4917 = vmatpush3.bf16.msra.mxu0 %v6373_v39 }
 0x468   : > { %4972 = vmatprep.subr.bf16.mxu0 %v5652_v33 }
 0x46a   : > { %4634 = vmatmul.mubr.f32.vlgmr.msra.gmra.mrb[2].mxu0 %v2239_v2  ;;  %v2757_v2 = vand.u32 4294901760, %v2756_v56 }
 0x46b   : > { %4748 = vmatprep.mubr.msk.f32.mxu0 %vm5653_vm2, %v5651_v0 }
 0x46c   : > { %v4922_v32 = vpack.c.bf16 %v2764_v54, %v2757_v2 }
 0x4d0   : > { %v2099_v31 = vpop.xlane.xlu0 %2098 }
 0x4d1   : > { %5203 = vrcp.f32 %v2099_v31 }
 0x4db   : > { %v5204_v47 = vpop.eup %5203 }
 0x4dc   : > { %v2101_v49 = vmul.f32 %v5204_v47, %v5200_v9  ;;  %v2102_v36 = vmul.f32 %v5204_v47, %v5202_v34  ;;  %v4925_v9 = vpack.c.bf16 %v2761_v1, %v2754_v13 }
 0x4de   : > { %v2106_v53 = vrot.slane %v2101_v49, %v6347_v4  ;;  %v2110_v50 = vrot.slane %v2102_v36, %v6347_v4 }
 0x4e0   : > { %v2111_v51 = vmul.f32 %v2106_v53, %v6236_v21  ;;  %v2112_v38 = vmul.f32 %v2110_v50, %v6230_v18  ;;  %v2113_v39 = vmul.f32 %v2106_v53, %v6241_v23  ;;  %v2114_v48 = vmul.f32 %v2110_v50, %v6233_v19 }
 0x4e1   : > { %v2117_v44 = vmul.f32 %v2106_v53, %v6257_v30  ;;  %v2118_v52 = vmul.f32 %v2110_v50, %v6248_v25  ;;  %v2115_v58 = vmul.f32 %v2106_v53, %v6254_v29  ;;  %v2116_v59 = vmul.f32 %v2110_v50, %v6245_v22 }
 0x4e2   : > { %v2119_v55 = vadd.f32 %v2112_v38, %v2111_v51  ;;  %v2122_v60 = vadd.f32 %v2114_v48, %v2113_v39 }
 0x4e3   : > { %v2128_v61 = vadd.f32 %v2118_v52, %v2117_v44  ;;  %v2125_v7 = vadd.f32 %v2116_v59, %v2115_v58 }
 0x4e4   : > { %2120 = vadd.xlane.f32.xlu0 %v2119_v55 }
 0x4e8   : > { %2126 = vadd.xlane.f32.xlu0 %v2125_v7  ;;  %v3135_v7 = vld [vmem:[#allocation16 + $0x8] sm:$0xff] }
 0x53d   : > { %v2651_v10 = vpop.f32.mrb[2].mxu0 }
 0x53e   : > { %v4635_v11 = vpop.f32.mrb[3].mxu0  ;;  %v2656_v12 = vsel %vm2655_vm6, %v2651_v10, 0.0 }
 0x53f   : > { %2657 = vadd.xlane.f32.xlu1 %v2656_v12 }
 0x571   : > { %v2121_v39 = vpop.xlane.xlu0 %2120 }
 0x572   : > { %v3147_v52 = vrot.slane %v2121_v39, %v6403_v17 }
 0x575   : > { %v2127_v55 = vpop.xlane.xlu0 %2126 }
 0x5cc   : > { %v2658_v16 = vpop.xlane.xlu1 %2657 }
 0x5cd   : > { %v2660_v62 = vmul.f32 0.0625, %v2658_v16  ;;  %v3169_v16 = vand.u32 4294901760, %v3135_v7 }
 0x5cf   : > { %v2661_v24 = vsub.f32 %v2651_v10, %v2660_v62  ;;  %v3136_v62 = vld [vmem:[#allocation16 + $0x10] sm:$0xff]  ;;  %v3253_v35 = vsub.f32 %v3135_v7, %v3169_v16 }
 0x5d0   : > { %v3172_v41 = vand.u32 4294901760, %v3136_v62 }
 0x5d1   : > { %v2662_v27 = vmul.f32 %v2661_v24, %v2661_v24  ;;  %v3254_v6 = vand.u32 4294901760, %v3253_v35 }
 0x5d2   : > { %v3260_v13 = vsub.f32 %v3136_v62, %v3172_v41 }
 0x5d3   : > { %v2663_v28 = vsel %vm2655_vm6, %v2662_v27, 0.0  ;;  %v3255_v54 = vsub.f32 %v3253_v35, %v3254_v6 }
 0x5d4   : > { %2664 = vadd.xlane.f32.xlu1 %v2663_v28 }
 0x5d8   : > { %2123 = vadd.xlane.f32.xlu1 %v2122_v60  ;;  %v3156_v60 = vrot.slane %v2127_v55, %v6409_v20  ;;  %v593_v55 = vand.u32 2147483647, %v6230_v18 }
 0x5dc   : > { %2129 = vadd.xlane.f32.xlu1 %v2128_v61  ;;  %v3134_v61 = vld [vmem:[#allocation16] sm:$0xff] }
 0x5dd   : > { %v3166_v12 = vand.u32 4294901760, %v3134_v61 }
 0x5df   : > { %v3246_v28 = vsub.f32 %v3134_v61, %v3166_v12  ;;  %v4937_v57 = vpack.c.bf16 %v3169_v16, %v3166_v12  ;;  %v597_v61 = vand.u32 2147483647, %v6245_v22 }
 0x5e1   : > { %v3247_v43 = vand.u32 4294901760, %v3246_v28 }
 0x5e3   : > { %v3248_v2 = vsub.f32 %v3246_v28, %v3247_v43 }
 0x661   : > { %v2665_v34 = vpop.xlane.xlu1 %2664 }
 0x662   : > { %v2666_v37 = vmul.f32 0.0625, %v2665_v34 }
 0x664   : > { %v2667_v40 = vadd.f32 1e-05, %v2666_v37  ;;  %v3256_v37 = vand.u32 4294901760, %v3255_v54 }
 0x665   : > { %v2124_v38 = vpop.xlane.xlu1 %2123 }
 0x666   : > { %5205 = vrsqrt.f32 %v2667_v40  ;;  %v3151_v48 = vrot.slane %v2124_v38, %v6406_v15  ;;  %v4961_v38 = vpack.c.bf16 %v3254_v6, %v3247_v43 }
 0x668   : > { %v3152_v58 = vsel %vm2152_vm3, %v3151_v48, %v3147_v52  ;;  %v592_v52 = vand.u32 2147483647, %v6236_v21  ;;  %v599_v21 = vand.u32 2147483647, %v6248_v25 }
 0x669   : > { %v2130_v44 = vpop.xlane.xlu1 %2129  ;;  %v3157_v10 = vsel %vm2159_vm4, %v3156_v60, %v3152_v58  ;;  %v594_v58 = vand.u32 2147483647, %v6241_v23  ;;  %v596_v60 = vand.u32 2147483647, %v6254_v29 }
 0x66a   : > { %v3161_v59 = vrot.slane %v2130_v44, %v6412_v26 }
 0x66b   : > { %v600_v7 = vadd.f32 %v594_v58, %v592_v52 }
 0x66c   : > { %v3162_v11 = vsel %vm2166_vm5, %v3161_v59, %v3157_v10  ;;  %v595_v59 = vand.u32 2147483647, %v6233_v19 }
 0x66d   : > { %v3163_v27 = vsel %vm943_vm0, %v3162_v11, 0  ;;  %v598_v11 = vand.u32 2147483647, %v6257_v30  ;;  %v601_v12 = vadd.f32 %v600_v7, %v596_v60  ;;  %v640_v7 = vadd.f32 %v593_v55, %v592_v52  ;;  %v3139_v30 = vld [vmem:[#allocation17 + $0x8] sm:$0xff] }
 0x66e   : > { %v6491_v8 = vand.u32 4294901760, %v3163_v27  ;;  %v609_v10 = vadd.f32 %v595_v59, %v593_v55  ;;  %v3671_v25 = vand.u32 4294901760, %v3139_v30 }
 0x66f   : > { %v602_v16 = vadd.f32 %v601_v12, %v598_v11 }
 0x670   : > { %v5206_v45 = vpop.eup %5205  ;;  %v3235_v56 = vsub.f32 %v3163_v27, %v6491_v8  ;;  %v610_v18 = vadd.f32 %v609_v10, %v597_v61  ;;  %v646_v10 = vadd.f32 %v597_v61, %v596_v60 }
 0x671   : > { %v2669_v46 = vmul.f32 %v5206_v45, %v2661_v24  ;;  %v3137_v24 = vld [vmem:[#allocation16 + $0x18] sm:$0xff]  ;;  %v603_v62 = vrot.slane %v602_v16, 4 }
 0x672   : > { %v3175_v42 = vand.u32 4294901760, %v3137_v24  ;;  %v611_v29 = vadd.f32 %v610_v18, %v599_v21 }
 0x673   : > { %v2670_v31 = vmax.f32 %v2669_v46, 0.0 }
 0x674   : > { %v3267_v1 = vsub.f32 %v3137_v24, %v3175_v42  ;;  %v4940_v34 = vpack.c.bf16 %v3175_v42, %v3172_v41  ;;  %v612_v22 = vrot.slane %v611_v29, 4  ;;  %v604_v24 = vadd.f32 %v603_v62, %v602_v16  ;;  %v6570_v16 = vld [vmem:[%s6087_s10 + $0x30] sm:$0xff]  ;;  %v6574_v62 = vld [vmem:[%s6087_s10 + $0x38] sm:$0xff] }
 0x675   : > { %v2673_v47 = vsel %vm2671_vm7, %v2670_v31, 0 }
 0x676   : > { %v2742_v49 = vand.u32 4294901760, %v2673_v47  ;;  %v613_v27 = vadd.f32 %v612_v22, %v611_v29  ;;  %v706_v29 = vand.u32 2147483647, %v6570_v16  ;;  %v707_v22 = vand.u32 2147483647, %v6574_v62 }
 0x678   : > { %v2743_v36 = vsub.f32 %v2673_v47, %v2742_v49  ;;  %v756_v19 = vadd.f32 %v707_v22, %v706_v29 }
 0x67a   : > { %v2744_v53 = vand.u32 4294901760, %v2743_v36 }
 0x67c   : > { %v2745_v50 = vsub.f32 %v2743_v36, %v2744_v53 }
 0x67e   : > { %v2746_v51 = vand.u32 4294901760, %v2745_v50  ;;  %v4949_v50 = vpack.c.bf16 %v3253_v35, %v3246_v28  ;;  %v605_v28 = vrot.slane %v604_v24, 2  ;;  %v614_v35 = vrot.slane %v613_v27, 2 }
 0x680   : > { %4641 = vmatmul.mubr.f32.vlgmr.msra.gmra.mrb[2].mxu1 %v2746_v51  ;;  %v4952_v51 = vpack.c.bf16 %v3267_v1, %v3260_v13  ;;  %v606_v41 = vadd.f32 %v605_v28, %v604_v24  ;;  %v615_v42 = vadd.f32 %v614_v35, %v613_v27 }
 0x681   : > { %4923 = vmatpush3.bf16.msra.mxu1 %v4922_v32  ;;  %4647 = vmatprep.mubr.msk.f32.mxu1 %vm5653_vm2, %v5651_v0  ;;  %v3261_v32 = vand.u32 4294901760, %v3260_v13 }
 0x682   : > { %4924 = vmatprep.subr.bf16.mxu1 %v5652_v33 }
 0x683   : > { %v3262_v40 = vsub.f32 %v3260_v13, %v3261_v32  ;;  %v616_v13 = vrot.slane %v615_v42, 1 }
 0x685   : > { %v3263_v47 = vand.u32 4294901760, %v3262_v40  ;;  %v617_v43 = vadd.f32 %v616_v13, %v615_v42 }
 0x688   : > { %4648 = vmatmul.mubr.f32.vlgmr.msra.gmra.mrb[2].mxu1 %v2742_v49 }
 0x689   : > { %4926 = vmatpush3.bf16.msra.mxu1 %v4925_v9  ;;  %4654 = vmatprep.mubr.msk.f32.mxu1 %vm5653_vm2, %v5651_v0  ;;  %v3268_v9 = vand.u32 4294901760, %v3267_v1 }
 0x68a   : > { %4927 = vmatprep.subr.bf16.mxu1 %v5652_v33 }
 0x68b   : > { %v3269_v45 = vsub.f32 %v3267_v1, %v3268_v9  ;;  %v4964_v39 = vpack.c.bf16 %v3268_v9, %v3261_v32 }
 0x690   : > { %4655 = vmatmul.mubr.f32.vlgmr.msra.gmra.mrb[2].mxu1 %v2743_v36  ;;  %v3270_v36 = vand.u32 4294901760, %v3269_v45  ;;  %v6552_v45 = vld [vmem:[%s6087_s10 + $0x10] sm:$0xff] }
 0x691   : > { %4929 = vmatpush3.bf16.msra.mxu1 %v6465_v3  ;;  %4661 = vmatprep.mubr.msk.f32.mxu1 %vm5653_vm2, %v5651_v0 }
 0x692   : > { %4930 = vmatprep.subr.bf16.mxu1 %v5652_v33 }
 0x698   : > { %4662 = vmatmul.mubr.f32.vlgmr.msra.gmra.mrb[2].mxu1 %v2744_v53 }
 0x699   : > { %4932 = vmatpush3.bf16.msra.mxu1 %v4931_v14  ;;  %4668 = vmatprep.mubr.msk.f32.mxu1 %vm5653_vm2, %v5651_v0  ;;  %v3236_v14 = vand.u32 4294901760, %v3235_v56 }
 0x69a   : > { %4933 = vmatprep.subr.bf16.mxu1 %v5652_v33 }
 0x69b   : > { %v3237_v46 = vsub.f32 %v3235_v56, %v3236_v14 }
 0x69d   : > { %v3238_v53 = vand.u32 4294901760, %v3237_v46  ;;  %v702_v46 = vand.u32 2147483647, %v6552_v45 }
 0x6a0   : > { %4669 = vmatmul.mubr.f32.vlgmr.msra.gmra.mrb[2].mxu1 %v2742_v49 }
 0x6a1   : > { %4935 = vmatpush3.bf16.msra.mxu1 %v6465_v3  ;;  %4675 = vmatprep.mubr.msk.f32.mxu1 %vm5653_vm2, %v5651_v0  ;;  %v3249_v3 = vand.u32 4294901760, %v3248_v2 }
 0x6a2   : > { %4936 = vmatprep.subr.bf16.mxu1 %v5652_v33 }
 0x6a3   : > { %v4943_v31 = vpack.c.bf16 %v3256_v37, %v3249_v3  ;;  %v6548_v37 = vld [vmem:[%s6087_s10 + $0x8] sm:$0xff] }
 0x6a4   : > { %v701_v40 = vand.u32 2147483647, %v6548_v37 }
 0x6a8   : > { %4676 = vmatmul.mubr.f32.vlgmr.msra.gmra.mrb[2].mxu1 %v2742_v49  ;;  %v4946_v49 = vpack.c.bf16 %v3270_v36, %v3263_v47  ;;  %v6560_v36 = vld [vmem:[%s6087_s10 + $0x20] sm:$0xff] }
 0x6a9   : > { %4938 = vmatpush3.bf16.msra.mxu1 %v4937_v57  ;;  %4686 = vmatprep.mubr.msk.f32.mxu1 %vm5653_vm2, %v5651_v0 }
 0x6aa   : > { %4939 = vmatprep.subr.bf16.mxu1 %v5652_v33 }
 0x6ad   : > { %4941 = vmatpush3.bf16.msra.mxu1 %v4940_v34 }
 0x6ae   : > { %4942 = vmatprep.subr.bf16.mxu1 %v5652_v33 }
 0x6b0   : > { %4687 = vmatmul.mubr.f32.vlgmr.msra.gmra.mrb[4].mxu1 %v3238_v53  ;;  %v704_v53 = vand.u32 2147483647, %v6560_v36 }
 0x6b1   : > { %4944 = vmatpush3.bf16.msra.mxu1 %v4943_v31  ;;  %4697 = vmatprep.mubr.msk.f32.mxu1 %vm5653_vm2, %v5651_v0  ;;  %v6556_v31 = vld [vmem:[%s6087_s10 + $0x18] sm:$0xff] }
 0x6b2   : > { %4945 = vmatprep.subr.bf16.mxu1 %v5652_v33  ;;  %v703_v47 = vand.u32 2147483647, %v6556_v31 }
 0x6b5   : > { %4947 = vmatpush3.bf16.msra.mxu1 %v4946_v49  ;;  %v6564_v49 = vld [vmem:[%s6087_s10 + $0x28] sm:$0xff] }
 0x6b6   : > { %4948 = vmatprep.subr.bf16.mxu1 %v5652_v33 }
 0x6b8   : > { %4698 = vmatmul.mubr.f32.vlgmr.msra.gmra.mrb[4].mxu1 %v6491_v8 }
 0x6b9   : > { %4950 = vmatpush3.bf16.msra.mxu1 %v4949_v50  ;;  %4708 = vmatprep.mubr.msk.f32.mxu1 %vm5653_vm2, %v5651_v0  ;;  %v705_v50 = vand.u32 2147483647, %v6564_v49 }
 0x6ba   : > { %4951 = vmatprep.subr.bf16.mxu1 %v5652_v33 }
 0x6bb   : > { %v753_v18 = vadd.f32 %v705_v50, %v704_v53 }
 0x6bd   : > { %4953 = vmatpush3.bf16.msra.mxu1 %v4952_v51 }
 0x6be   : > { %4954 = vmatprep.subr.bf16.mxu1 %v5652_v33 }
 0x6c0   : > { %4709 = vmatmul.mubr.f32.vlgmr.msra.gmra.mrb[4].mxu1 %v3235_v56  ;;  %v620_v56 = vmul.f32 0.03125, %v617_v43 }
 0x6c1   : > { %4956 = vmatpush3.bf16.msra.mxu1 %v4937_v57  ;;  %4719 = vmatprep.mubr.msk.f32.mxu1 %vm5653_vm2, %v5651_v0 }
 0x6c2   : > { %4957 = vmatprep.subr.bf16.mxu1 %v5652_v33  ;;  %v622_v2 = vmul.f32 2.0, %v620_v56 }
 0x6c5   : > { %4959 = vmatpush3.bf16.msra.mxu1 %v4940_v34 }
 0x6c6   : > { %4960 = vmatprep.subr.bf16.mxu1 %v5652_v33 }
 0x6c8   : > { %4720 = vmatmul.mubr.f32.vlgmr.msra.gmra.mrb[4].mxu1 %v3236_v14 }
 0x6c9   : > { %4962 = vmatpush3.bf16.msra.mxu1 %v4961_v38  ;;  %4730 = vmatprep.mubr.msk.f32.mxu1 %vm5653_vm2, %v5651_v0  ;;  %v717_v38 = vadd.f32 %v703_v47, %v701_v40 }
 0x6ca   : > { %4963 = vmatprep.subr.bf16.mxu1 %v5652_v33 }
 0x6cd   : > { %4965 = vmatpush3.bf16.msra.mxu1 %v4964_v39 }
 0x6ce   : > { %4966 = vmatprep.subr.bf16.mxu1 %v5652_v33 }
 0x6d0   : > { %4731 = vmatmul.mubr.f32.vlgmr.msra.gmra.mrb[4].mxu1 %v6491_v8 }
 0x6d1   : > { %4968 = vmatpush3.bf16.msra.mxu1 %v4937_v57  ;;  %4741 = vmatprep.mubr.msk.f32.mxu1 %vm5653_vm2, %v5651_v0 }
 0x6d2   : > { %4969 = vmatprep.subr.bf16.mxu1 %v5652_v33 }
 0x6d5   : > { %4971 = vmatpush3.bf16.msra.mxu1 %v4940_v34  ;;  %v6544_v34 = vld [vmem:[%s6087_s10] sm:$0xff]  ;;  %s4467_s10 = sshll.u32 %s6929_s21, 7  ;;  %s5654_s21 = smov [#allocation19]  }
 0x6d6   : > { %v700_v3 = vand.u32 2147483647, %v6544_v34 }
 0x6d8   : > { %4742 = vmatmul.mubr.f32.vlgmr.msra.gmra.mrb[4].mxu1 %v6491_v8  ;;  %v607_v8 = vrot.slane %v606_v41, 1  ;;  %v708_v51 = vadd.f32 %v702_v46, %v700_v3  ;;  %v747_v12 = vadd.f32 %v701_v40, %v700_v3 }
 0x6da   : > { %v608_v1 = vadd.f32 %v607_v8, %v606_v41  ;;  %v709_v39 = vadd.f32 %v708_v51, %v704_v53 }
 0x6dc   : > { %v619_v6 = vmul.f32 0.03125, %v608_v1  ;;  %v710_v24 = vadd.f32 %v709_v39, %v706_v29 }
 0x6de   : > { %v621_v57 = vmul.f32 2.0, %v619_v6  ;;  %v711_v28 = vrot.slane %v710_v24, 4 }
 0x6e0   : > { %v623_v14 = vmax.f32 %v621_v57, %v622_v2  ;;  %v712_v52 = vadd.f32 %v711_v28, %v710_v24  ;;  %v6608_v24 = vsub.f32 %v3139_v30, %v3671_v25 }
 0x6e2   : > { %v713_v60 = vrot.slane %v712_v52, 2 }
 0x6e4   : > { %v714_v41 = vadd.f32 %v713_v60, %v712_v52  ;;  %v5249_v60 = vld [vmem:[%s6094_s18] sm:$0xff] }
 0x6e6   : > { %v715_v8 = vrot.slane %v714_v41, 1 }
 0x6e8   : > { %v716_v1 = vadd.f32 %v715_v8, %v714_v41  ;;  %v5250_v41 = vld [vmem:[%s6094_s18 + $0x8] sm:$0xff] }
 0x6ea   : > { %v726_v56 = vmul.f32 0.03125, %v716_v1 }
 0x6ec   : > { %v6579_v3 = vmul.f32 2.0, %v726_v56 }
 0x77b   : > { %v6524_v48 = vpop.f32.mrb[2].mxu1 }
 0x77c   : > { %v4677_v44 = vpop.f32.mrb[3].mxu1 }
 0x77d   : > { %v718_v44 = vadd.f32 %v717_v38, %v705_v50 }
 0x77f   : > { %v719_v27 = vadd.f32 %v718_v44, %v707_v22 }
 0x781   : > { %v720_v35 = vrot.slane %v719_v27, 4 }
 0x783   : > { %v721_v55 = vadd.f32 %v720_v35, %v719_v27 }
 0x785   : > { %v722_v61 = vrot.slane %v721_v55, 2 }
 0x787   : > { %v723_v42 = vadd.f32 %v722_v61, %v721_v55  ;;  %v848_v61 = vsub.f32 %v6544_v34, %v5249_v60 }
 0x789   : > { %v724_v13 = vrot.slane %v723_v42, 1  ;;  %v6626_v8 = vmul.f32 %v848_v61, %v848_v61 }
 0x78b   : > { %v725_v43 = vadd.f32 %v724_v13, %v723_v42  ;;  %v849_v42 = vsub.f32 %v6548_v37, %v5250_v41 }
 0x78d   : > { %v6628_v13 = vmul.f32 %v849_v42, %v849_v42  ;;  %v4127_v1 = vadd.f32 %v849_v42, %v848_v61 }
 0x7ab   : > { %v3646_v54 = vpop.f32.mrb[4].mxu1 }
 0x7ac   : > { %v4743_v32 = vpop.f32.mrb[5].mxu1  ;;  %v3650_v9 = vsel %vm2655_vm6, %v3646_v54, 0.0 }
 0x7ad   : > { %3651 = vadd.xlane.f32.xlu0 %v3650_v9  ;;  %v727_v32 = vmul.f32 0.03125, %v725_v43  ;;  %v6632_v43 = vadd.f32 %v6628_v13, %v6626_v8 }
 0x7af   : > { %v6581_v40 = vmul.f32 2.0, %v727_v32  ;;  %v5252_v32 = vld [vmem:[%s6094_s18 + $0x28] sm:$0xff] }
 0x7b0   : > { %v6640_v34 = vsub.f32 %v6564_v49, %v5252_v32 }
 0x7b1   : > { %624 = vmax.xlane.f32.xlu0 %v623_v14 }
 0x7b5   : > { %641 = vadd.xlane.f32.xlu0 %v640_v7 }
 0x7b9   : > { %647 = vadd.xlane.f32.xlu0 %v646_v10  ;;  %v730_v10 = vmax.f32 %v6579_v3, %v6581_v40 }
 0x7bd   : > { %748 = vadd.xlane.f32.xlu0 %v747_v12 }
 0x7c1   : > { %754 = vadd.xlane.f32.xlu0 %v753_v18  ;;  %v750_v18 = vadd.f32 %v703_v47, %v702_v46  ;;  %v3754_v47 = vand.u32 4294901760, %v6608_v24 }
 0x7c3   : > { %v3755_v22 = vsub.f32 %v6608_v24, %v3754_v47 }
 0x7c5   : > { %v3756_v28 = vand.u32 4294901760, %v3755_v22 }
 0x83a   : > { %v3652_v6 = vpop.xlane.xlu0 %3651 }
 0x83b   : > { %v3653_v9 = vmul.f32 0.0625, %v3652_v6  ;;  %v5251_v6 = vld [vmem:[%s6094_s18 + $0x20] sm:$0xff] }
 0x83c   : > { %v6636_v56 = vsub.f32 %v6560_v36, %v5251_v6 }
 0x83d   : > { %v6577_v14 = vsub.f32 %v3646_v54, %v3653_v9  ;;  %v643_v54 = vadd.f32 %v595_v59, %v594_v58  ;;  %v3138_v58 = vld [vmem:[#allocation17] sm:$0xff] }
 0x83e   : > { %v625_v53 = vpop.xlane.xlu0 %624  ;;  %v3668_v59 = vand.u32 4294901760, %v3138_v58  ;;  %v4133_v37 = vadd.f32 %v6640_v34, %v6636_v56 }
 0x83f   : > { %v3655_v50 = vmul.f32 %v6577_v14, %v6577_v14  ;;  %v626_v51 = vsub.f32 %v621_v57, %v625_v53  ;;  %v627_v38 = vsub.f32 %v622_v2, %v625_v53  ;;  %v649_v57 = vadd.f32 %v599_v21, %v598_v11 }
 0x840   : > { %v6604_v11 = vpack.c.bf16 %v3671_v25, %v3668_v59  ;;  %v6606_v21 = vsub.f32 %v3138_v58, %v3668_v59 }
 0x841   : > { %v3656_v39 = vsel %vm2655_vm6, %v3655_v50, 0.0  ;;  %v628_v44 = vmul.f32 1.442695, %v626_v51  ;;  %v630_v7 = vmul.f32 1.442695, %v627_v38 }
 0x842   : > { %3657 = vadd.xlane.f32.xlu1 %v3656_v39  ;;  %4974 = vmatpush3.bf16.msra.mxu0 %v6604_v11  ;;  %v3747_v46 = vand.u32 4294901760, %v6606_v21  ;;  %v4979_v52 = vpack.c.bf16 %v6608_v24, %v6606_v21  ;;  %v642_v9 = vpop.xlane.xlu0 %641 }
 0x843   : > { %5207 = vpow2.f32 %v628_v44  ;;  %4975 = vmatprep.subr.bf16.mxu0 %v5652_v33 }
 0x844   : > { %5209 = vpow2.f32 %v630_v7  ;;  %v3748_v29 = vsub.f32 %v6606_v21, %v3747_v46  ;;  %v6620_v55 = vpack.c.bf16 %v3754_v47, %v3747_v46 }
 0x846   : > { %731 = vmax.xlane.f32.xlu1 %v730_v10  ;;  %v3749_v27 = vand.u32 4294901760, %v3748_v29  ;;  %v648_v36 = vpop.xlane.xlu0 %647 }
 0x848   : > { %v6616_v35 = vpack.c.bf16 %v3756_v28, %v3749_v27 }
 0x84a   : > { %644 = vadd.xlane.f32.xlu1 %v643_v54  ;;  %v653_v54 = vmul.f32 0.00390625, %v642_v9 }
 0x84d   : > { %v6596_v2 = vpop.eup %5207 }
 0x84e   : > { %v6598_v12 = vpop.eup %5209  ;;  %650 = vadd.xlane.f32.xlu1 %v649_v57 }
 0x84f   : > { %v634_v23 = vadd.f32 %v6598_v12, %v6596_v2 }
 0x851   : > { %635 = vadd.xlane.f32.xlu0 %v634_v23  ;;  %v749_v23 = vpop.xlane.xlu0 %748 }
 0x852   : > { %751 = vadd.xlane.f32.xlu1 %v750_v18  ;;  %v655_v18 = vmul.f32 0.00390625, %v648_v36  ;;  %v759_v22 = vmul.f32 0.00390625, %v749_v23 }
 0x854   : > { %v6650_v59 = vmul.f32 2.0, %v655_v18 }
 0x855   : > { %4128 = vadd.xlane.f32.xlu0 %v4127_v1  ;;  %v755_v47 = vpop.xlane.xlu0 %754 }
 0x856   : > { %757 = vadd.xlane.f32.xlu1 %v756_v19  ;;  %v6646_v19 = vmul.f32 2.0, %v653_v54  ;;  %v761_v41 = vmul.f32 0.00390625, %v755_v47 }
 0x859   : > { %4134 = vadd.xlane.f32.xlu0 %v4133_v37  ;;  %v6661_v37 = vmul.f32 2.0, %v759_v22 }
 0x8cf   : > { %v3658_v53 = vpop.xlane.xlu1 %3657 }
 0x8d0   : > { %v3659_v50 = vmul.f32 0.0625, %v3658_v53  ;;  %v5253_v53 = vld [vmem:[%s6094_s18 + $0x10] sm:$0xff] }
 0x8d2   : > { %v3660_v51 = vadd.f32 1e-05, %v3659_v50  ;;  %v6667_v50 = vsub.f32 %v6552_v45, %v5253_v53 }
 0x8d3   : > { %v732_v38 = vpop.xlane.xlu1 %731 }
 0x8d4   : > { %5211 = vrsqrt.f32 %v3660_v51  ;;  %v733_v39 = vsub.f32 %v6579_v3, %v732_v38  ;;  %v734_v44 = vsub.f32 %v6581_v40, %v732_v38 }
 0x8d6   : > { %v735_v7 = vmul.f32 1.442695, %v733_v39  ;;  %v737_v10 = vmul.f32 1.442695, %v734_v44  ;;  %v5254_v44 = vld [vmem:[%s6094_s18 + $0x18] sm:$0xff] }
 0x8d7   : > { %v645_v49 = vpop.xlane.xlu1 %644  ;;  %v6675_v36 = vsub.f32 %v6556_v31, %v5254_v44 }
 0x8d8   : > { %5213 = vpow2.f32 %v735_v7  ;;  %v654_v57 = vmul.f32 0.00390625, %v645_v49  ;;  %v765_v7 = vmul.f32 2.0, %v761_v41 }
 0x8d9   : > { %5215 = vpow2.f32 %v737_v10  ;;  %v4130_v45 = vadd.f32 %v6675_v36, %v6667_v50 }
 0x8da   : > { %v6648_v58 = vmul.f32 2.0, %v654_v57 }
 0x8db   : > { %v651_v30 = vpop.xlane.xlu1 %650 }
 0x8dc   : > { %v656_v3 = vmul.f32 0.00390625, %v651_v30  ;;  %v661_v40 = vmax.f32 %v6646_v19, %v6648_v58 }
 0x8de   : > { %v5212_v25 = vpop.eup %5211  ;;  %v660_v46 = vmul.f32 2.0, %v656_v3  ;;  %v5255_v3 = vld [vmem:[%s6094_s18 + $0x30] sm:$0xff] }
 0x8df   : > { %v3662_v29 = vmul.f32 %v5212_v25, %v6577_v14  ;;  %v752_v27 = vpop.xlane.xlu1 %751  ;;  %v6687_v31 = vsub.f32 %v6570_v16, %v5255_v3  ;;  %v5256_v25 = vld [vmem:[%s6094_s18 + $0x38] sm:$0xff] }
 0x8e0   : > { %v662_v28 = vmax.f32 %v6650_v59, %v660_v46  ;;  %v760_v60 = vmul.f32 0.00390625, %v752_v27 }
 0x8e1   : > { %v3663_v61 = vmax.f32 %v3662_v29, 0.0 }
 0x8e2   : > { %v6656_v42 = vpop.eup %5213  ;;  %v663_v1 = vmax.f32 %v661_v40, %v662_v28  ;;  %v6663_v9 = vmul.f32 2.0, %v760_v60  ;;  %v6691_v40 = vsub.f32 %v6574_v62, %v5256_v25 }
 0x8e3   : > { %v6658_v6 = vpop.eup %5215  ;;  %v3665_v32 = vsel %vm2671_vm7, %v3663_v61, 0  ;;  %v758_v14 = vpop.xlane.xlu1 %757 }
 0x8e4   : > { %v741_v51 = vadd.f32 %v6658_v6, %v6656_v42  ;;  %v664_v38 = vrot.slane %v663_v1, 4  ;;  %v6671_v39 = vand.u32 4294901760, %v3665_v32  ;;  %v762_v10 = vmul.f32 0.00390625, %v758_v14 }
 0x8e5   : > { %v767_v57 = vmax.f32 %v6661_v37, %v6663_v9  ;;  %v4136_v27 = vadd.f32 %v6691_v40, %v6687_v31 }
 0x8e6   : > { %742 = vadd.xlane.f32.xlu1 %v741_v51  ;;  %v665_v54 = vmax.f32 %v663_v1, %v664_v38  ;;  %v6678_v49 = vsub.f32 %v3665_v32, %v6671_v39  ;;  %v766_v18 = vmul.f32 2.0, %v762_v10 }
 0x8e8   : > { %v666_v23 = vrot.slane %v665_v54, 2  ;;  %v3736_v30 = vand.u32 4294901760, %v6678_v49  ;;  %v768_v47 = vmax.f32 %v765_v7, %v766_v18 }
 0x8ea   : > { %v667_v29 = vmax.f32 %v665_v54, %v666_v23  ;;  %v3737_v22 = vsub.f32 %v6678_v49, %v3736_v30  ;;  %4131 = vadd.xlane.f32.xlu1 %v4130_v45  ;;  %v769_v28 = vmax.f32 %v767_v57, %v768_v47 }
 0x8ec   : > { %v668_v60 = vrot.slane %v667_v29, 1  ;;  %v3738_v61 = vand.u32 4294901760, %v3737_v22  ;;  %v770_v41 = vrot.slane %v769_v28, 4 }
 0x8ee   : > { %v669_v16 = vmax.f32 %v667_v29, %v668_v60  ;;  %4749 = vmatmul.mubr.f32.vlgmr.msra.gmra.mrb[4].mxu0 %v3738_v61  ;;  %4137 = vadd.xlane.f32.xlu1 %v4136_v27  ;;  %v771_v62 = vmax.f32 %v769_v28, %v770_v41 }
 0x8ef   : > { %4977 = vmatpush3.bf16.msra.mxu0 %v6616_v35  ;;  %4755 = vmatprep.mubr.msk.f32.mxu0 %vm5653_vm2, %v5651_v0 }
 0x8f0   : > { %v670_v1 = vsub.f32 %v6646_v19, %v669_v16  ;;  %v671_v32 = vsub.f32 %v6648_v58, %v669_v16  ;;  %v672_v14 = vsub.f32 %v6650_v59, %v669_v16  ;;  %v673_v53 = vsub.f32 %v660_v46, %v669_v16  ;;  %4978 = vmatprep.subr.bf16.mxu0 %v5652_v33 }
 0x8f1   : > { %v772_v51 = vrot.slane %v771_v62, 2 }
 0x8f2   : > { %v674_v38 = vmul.f32 1.442695, %v670_v1  ;;  %v676_v44 = vmul.f32 1.442695, %v671_v32  ;;  %v678_v10 = vmul.f32 1.442695, %v672_v14 }
 0x8f3   : > { %v680_v54 = vmul.f32 1.442695, %v673_v53  ;;  %v773_v45 = vmax.f32 %v771_v62, %v772_v51 }
 0x8f4   : > { %5217 = vpow2.f32 %v674_v38 }
 0x8f5   : > { %5219 = vpow2.f32 %v676_v44  ;;  %v774_v35 = vrot.slane %v773_v45, 1 }
 0x8f6   : > { %5221 = vpow2.f32 %v678_v10  ;;  %4756 = vmatmul.mubr.f32.vlgmr.msra.gmra.mrb[4].mxu0 %v6671_v39 }
 0x8f7   : > { %5223 = vpow2.f32 %v680_v54  ;;  %4980 = vmatpush3.bf16.msra.mxu0 %v4979_v52  ;;  %v775_v19 = vmax.f32 %v773_v45, %v774_v35  ;;  %4762 = vmatprep.mubr.msk.f32.mxu0 %vm5653_vm2, %v5651_v0 }
 0x8f8   : > { %4981 = vmatprep.subr.bf16.mxu0 %v5652_v33 }
 0x8f9   : > { %v776_v58 = vsub.f32 %v6661_v37, %v775_v19  ;;  %v777_v59 = vsub.f32 %v6663_v9, %v775_v19  ;;  %v778_v46 = vsub.f32 %v765_v7, %v775_v19  ;;  %v779_v57 = vsub.f32 %v766_v18, %v775_v19 }
 0x8fa   : > { %v6740_v19 = vmul.f32 %v6636_v56, %v6636_v56 }
 0x8fb   : > { %v780_v23 = vmul.f32 1.442695, %v776_v58  ;;  %v782_v3 = vmul.f32 1.442695, %v777_v59  ;;  %v784_v25 = vmul.f32 1.442695, %v778_v46  ;;  %v6748_v58 = vmul.f32 %v6687_v31, %v6687_v31  ;;  %v636_v59 = vpop.xlane.xlu0 %635 }
 0x8fc   : > { %v786_v47 = vmul.f32 1.442695, %v779_v57 }
 0x8fd   : > { %5225 = vpow2.f32 %v780_v23 }
 0x8fe   : > { %v5218_v29 = vpop.eup %5217  ;;  %5227 = vpow2.f32 %v782_v3  ;;  %4763 = vmatmul.mubr.f32.vlgmr.msra.gmra.mrb[4].mxu0 %v6678_v49 }
 0x8ff   : > { %v5220_v21 = vpop.eup %5219  ;;  %5229 = vpow2.f32 %v784_v25  ;;  %4983 = vmatpush3.bf16.msra.mxu0 %v6604_v11  ;;  %4769 = vmatprep.mubr.msk.f32.mxu0 %vm5653_vm2, %v5651_v0  ;;  %v682_v38 = vmul.f32 32.0, %v5218_v29 }
 0x900   : > { %v5222_v24 = vpop.eup %5221  ;;  %v686_v52 = vadd.f32 %v5220_v21, %v5218_v29  ;;  %5231 = vpow2.f32 %v786_v47  ;;  %4984 = vmatprep.subr.bf16.mxu0 %v5652_v33  ;;  %v683_v10 = vmul.f32 32.0, %v5220_v21 }
 0x901   : > { %v5224_v37 = vpop.eup %5223  ;;  %v684_v54 = vmul.f32 32.0, %v5222_v24 }
 0x902   : > { %v687_v9 = vadd.f32 %v5222_v24, %v686_v52  ;;  %v685_v45 = vmul.f32 32.0, %v5224_v37 }
 0x904   : > { %v688_v7 = vadd.f32 %v5224_v37, %v687_v9 }
 0x906   : > { %v689_v18 = vrot.slane %v688_v7, 4  ;;  %4770 = vmatmul.mubr.f32.vlgmr.msra.gmra.mrb[4].mxu0 %v3736_v30 }
 0x907   : > { %v5226_v22 = vpop.eup %5225  ;;  %4986 = vmatpush3.bf16.msra.mxu0 %v6620_v55  ;;  %4776 = vmatprep.mubr.msk.f32.mxu0 %vm5653_vm2, %v5651_v0 }
 0x908   : > { %v5228_v27 = vpop.eup %5227  ;;  %v690_v28 = vadd.f32 %v689_v18, %v688_v7  ;;  %4987 = vmatprep.subr.bf16.mxu0 %v5652_v33  ;;  %v788_v52 = vmul.f32 32.0, %v5226_v22 }
 0x909   : > { %v5230_v60 = vpop.eup %5229  ;;  %v792_v61 = vadd.f32 %v5228_v27, %v5226_v22  ;;  %v789_v37 = vmul.f32 32.0, %v5228_v27  ;;  %v632_v22 = vmul.f32 256.0, %v6596_v2  ;;  %v899_v2 = vsub.s32 1, %v6344_v63 }
 0x90a   : > { %v5232_v41 = vpop.eup %5231  ;;  %v691_v16 = vrot.slane %v690_v28, 2 }
 0x90b   : > { %v793_v62 = vadd.f32 %v5230_v60, %v792_v61  ;;  %v791_v9 = vmul.f32 32.0, %v5232_v41 }
 0x90c   : > { %v692_v1 = vadd.f32 %v691_v16, %v690_v28 }
 0x90d   : > { %v794_v32 = vadd.f32 %v5232_v41, %v793_v62 }
 0x90e   : > { %v693_v14 = vrot.slane %v692_v1, 1  ;;  %4777 = vmatmul.mubr.f32.vlgmr.msra.gmra.mrb[4].mxu0 %v6671_v39 }
 0x90f   : > { %v795_v49 = vrot.slane %v794_v32, 4  ;;  %4989 = vmatpush3.bf16.msra.mxu0 %v6604_v11  ;;  %4783 = vmatprep.mubr.msk.f32.mxu0 %vm5653_vm2, %v5651_v0  ;;  %v6732_v11 = vmul.f32 %v6667_v50, %v6667_v50  ;;  %v6736_v0 = vmul.f32 %v6675_v36, %v6675_v36  ;;  %v6752_v50 = vmul.f32 %v6691_v40, %v6691_v40 }
 0x910   : > { %v694_v55 = vadd.f32 %v693_v14, %v692_v1 }
 0x911   : > { %v796_v30 = vadd.f32 %v795_v49, %v794_v32 }
 0x912   : > { %5233 = vrcp.f32 %v694_v55 }
 0x913   : > { %v797_v33 = vrot.slane %v796_v30, 2 }
 0x915   : > { %v798_v53 = vadd.f32 %v797_v33, %v796_v30 }
 0x916   : > { %4784 = vmatmul.mubr.f32.vlgmr.msra.gmra.mrb[4].mxu0 %v6671_v39  ;;  %v6744_v39 = vmul.f32 %v6640_v34, %v6640_v34 }
 0x917   : > { %v799_v51 = vrot.slane %v798_v53, 1 }
 0x919   : > { %v800_v44 = vadd.f32 %v799_v51, %v798_v53 }
 0x91b   : > { %5235 = vrcp.f32 %v800_v44 }
 0x91c   : > { %v5234_v35 = vpop.eup %5233  ;;  %5237 = vrcp.f32 %v636_v59 }
 0x91d   : > { %v696_v36 = vmul.f32 %v5234_v35, %v682_v38  ;;  %v697_v46 = vmul.f32 %v5234_v35, %v683_v10  ;;  %v698_v57 = vmul.f32 %v5234_v35, %v684_v54  ;;  %v699_v23 = vmul.f32 %v5234_v35, %v685_v45 }
 0x91e   : > { %v633_v54 = vmul.f32 256.0, %v6598_v12 }
 0x91f   : > { %v864_v56 = vmul.f32 %v6626_v8, %v696_v36  ;;  %v865_v3 = vmul.f32 %v6628_v13, %v696_v36  ;;  %v866_v34 = vmul.f32 %v6732_v11, %v697_v46  ;;  %v867_v25 = vmul.f32 %v6736_v0, %v697_v46 }
 0x920   : > { %v868_v31 = vmul.f32 %v6740_v19, %v698_v57  ;;  %v869_v47 = vmul.f32 %v6744_v39, %v698_v57  ;;  %v870_v21 = vmul.f32 %v6748_v58, %v699_v23  ;;  %v871_v24 = vmul.f32 %v6752_v50, %v699_v23 }
 0x921   : > { %v872_v40 = vadd.f32 %v866_v34, %v864_v56  ;;  %v881_v29 = vadd.f32 %v867_v25, %v865_v3  ;;  %v790_v8 = vmul.f32 32.0, %v5230_v60  ;;  %v591_v34 = vld [vmem:[%s6103_s30] sm:$0x3]  ;;  %s4227_s30 = scalar_lea.sflag [#allocation4], %s6083_s12 }
 0x923   : > { %v873_v13 = vadd.f32 %v872_v40, %v868_v31  ;;  %v882_v7 = vadd.f32 %v881_v29, %v869_v47 }
 0x925   : > { %v5236_v18 = vpop.eup %5235  ;;  %v874_v28 = vadd.f32 %v873_v13, %v870_v21  ;;  %v883_v61 = vadd.f32 %v882_v7, %v871_v24 }
 0x926   : > { %v802_v16 = vmul.f32 %v5236_v18, %v788_v52  ;;  %v803_v62 = vmul.f32 %v5236_v18, %v789_v37  ;;  %v804_v1 = vmul.f32 %v5236_v18, %v790_v8  ;;  %v805_v32 = vmul.f32 %v5236_v18, %v791_v9  ;;  %v5238_v41 = vpop.eup %5237 }
 0x927   : > { %v875_v14 = vrot.slane %v874_v28, 4  ;;  %v884_v49 = vrot.slane %v883_v61, 4  ;;  %v638_v31 = vmul.f32 %v5238_v41, %v632_v22  ;;  %v639_v12 = vmul.f32 %v5238_v41, %v633_v54 }
 0x928   : > { %v806_v55 = vsub.f32 %v802_v16, %v696_v36  ;;  %v807_v30 = vsub.f32 %v803_v62, %v697_v46  ;;  %v808_v33 = vsub.f32 %v804_v1, %v698_v57  ;;  %v809_v53 = vsub.f32 %v805_v32, %v699_v23  ;;  %v590_v23 = vld [vmem:[%s6101_s17] sm:$0x3]  ;;  %s6939_s17 = sld [smem:[#allocation39_spill]] }
 0x929   : > { %v876_v27 = vadd.f32 %v875_v14, %v874_v28  ;;  %v885_v60 = vadd.f32 %v884_v49, %v883_v61  ;;  %v896_v21 = vrot.slane %v590_v23, %v6347_v4  ;;  %v900_v24 = vrot.slane %v590_v23, %v899_v2 }
 0x92a   : > { %v810_v51 = vand.u32 2147483647, %v806_v55  ;;  %v811_v38 = vand.u32 2147483647, %v807_v30  ;;  %v812_v44 = vand.u32 2147483647, %v808_v33  ;;  %v921_v52 = vrot.slane %v591_v34, %v6347_v4 }
 0x92b   : > { %v813_v10 = vand.u32 2147483647, %v809_v53  ;;  %v877_v45 = vrot.slane %v876_v27, 2  ;;  %v886_v35 = vrot.slane %v885_v60, 2  ;;  %v925_v9 = vrot.slane %v591_v34, %v899_v2 }
 0x92c   : > { %v815_v59 = vsel %vm814_vm8, %v810_v51, 0.0  ;;  %v816_v36 = vsel %vm814_vm8, %v811_v38, 0.0  ;;  %v818_v46 = vsel %vm814_vm8, %v812_v44, 0.0  ;;  %v4140_v55 = vadd.f32 %v6632_v43, %v6732_v11 }
 0x92d   : > { %v817_v57 = vadd.f32 %v816_v36, %v815_v59  ;;  %v878_v56 = vadd.f32 %v877_v45, %v876_v27  ;;  %v887_v3 = vadd.f32 %v886_v35, %v885_v60  ;;  %v820_v25 = vsel %vm814_vm8, %v813_v10, 0.0 }
 0x92e   : > { %v4141_v30 = vadd.f32 %v4140_v55, %v6736_v0  ;;  %v739_v41 = vmul.f32 256.0, %v6656_v42  ;;  %v740_v51 = vmul.f32 256.0, %v6658_v6  ;;  %s6806_s28 = scalar_lea.hbm %s6939_s17, %s4467_s10 }
 0x92f   : > { %v819_v47 = vadd.f32 %v818_v46, %v817_v57  ;;  %v879_v40 = vrot.slane %v878_v56, 1  ;;  %v888_v29 = vrot.slane %v887_v3, 1 }
 0x930   : > { %v4142_v33 = vadd.f32 %v4141_v30, %v6740_v19 }
 0x931   : > { %v821_v37 = vadd.f32 %v820_v25, %v819_v47  ;;  %v880_v8 = vadd.f32 %v879_v40, %v878_v56  ;;  %v889_v63 = vadd.f32 %v888_v29, %v887_v3 }
 0x932   : > { %v4143_v53 = vadd.f32 %v4142_v33, %v6744_v39 }
 0x933   : > { %822 = vadd.xlane.f32.xlu0 %v821_v37  ;;  %v890_v13 = vmul.f32 %v880_v8, %v638_v31  ;;  %v891_v7 = vmul.f32 %v889_v63, %v639_v12 }
 0x934   : > { %v4144_v22 = vadd.f32 %v4143_v53, %v6748_v58 }
 0x935   : > { %v903_v18 = vmul.f32 %v896_v21, %v890_v13  ;;  %v904_v28 = vmul.f32 %v900_v24, %v891_v7  ;;  %v928_v61 = vmul.f32 %v921_v52, %v890_v13  ;;  %v929_v16 = vmul.f32 %v925_v9, %v891_v7 }
 0x936   : > { %v4145_v27 = vadd.f32 %v4144_v22, %v6752_v50  ;;  %v4129_v50 = vpop.xlane.xlu0 %4128 }
 0x937   : > { %v905_v62 = vsel %vm835_vm1, %v903_v18, 0.0  ;;  %v906_v1 = vsel %vm835_vm1, %v904_v28, 0.0  ;;  %v930_v32 = vsel %vm835_vm1, %v928_v61, 0.0  ;;  %v931_v14 = vsel %vm835_vm1, %v929_v16, 0.0 }
 0x938   : > { %v907_v4 = vadd.f32 %v906_v1, %v905_v62  ;;  %v932_v49 = vadd.f32 %v931_v14, %v930_v32  ;;  %v4162_v23 = vrot.slane %v4129_v50, %v6403_v17 }
 0x93a   : > { %908 = vadd.xlane.f32.xlu0 %v907_v4  ;;  %v4135_v45 = vpop.xlane.xlu0 %4134 }
 0x93b   : > { %v4171_v3 = vrot.slane %v4135_v45, %v6409_v20 }
 0x93e   : > { %4146 = vadd.xlane.f32.xlu0 %v4145_v27 }
 0x973   : > { %v743_v60 = vpop.xlane.xlu1 %742 }
 0x974   : > { %5239 = vrcp.f32 %v743_v60 }
 0x977   : > { %v4132_v57 = vpop.xlane.xlu1 %4131 }
 0x978   : > { %v4166_v56 = vrot.slane %v4132_v57, %v6406_v15 }
 0x97a   : > { %v4167_v25 = vsel %vm2152_vm3, %v4166_v56, %v4162_v23 }
 0x97b   : > { %v4138_v34 = vpop.xlane.xlu1 %4137  ;;  %v4172_v47 = vsel %vm2159_vm4, %v4171_v3, %v4167_v25 }
 0x97e   : > { %v5240_v38 = vpop.eup %5239 }
 0x97f   : > { %v745_v44 = vmul.f32 %v5240_v38, %v739_v41  ;;  %v746_v43 = vmul.f32 %v5240_v38, %v740_v51 }
 0x981   : > { %v831_v11 = vsub.f32 %v745_v44, %v638_v31  ;;  %v832_v0 = vsub.f32 %v746_v43, %v639_v12  ;;  %v4176_v31 = vrot.slane %v4138_v34, %v6412_v26 }
 0x983   : > { %v833_v10 = vand.u32 2147483647, %v831_v11  ;;  %v834_v19 = vand.u32 2147483647, %v832_v0  ;;  %v4177_v21 = vsel %vm2166_vm5, %v4176_v31, %v4172_v47 }
 0x985   : > { %v836_v39 = vsel %vm835_vm1, %v833_v10, 0.0  ;;  %v837_v58 = vsel %vm835_vm1, %v834_v19, 0.0 }
 0x986   : > { %v838_v54 = vadd.f32 %v837_v58, %v836_v39 }
 0x988   : > { %839 = vadd.xlane.f32.xlu1 %v838_v54 }
 0x98c   : > { %933 = vadd.xlane.f32.xlu1 %v932_v49 }
 0x9c0   : > { %v823_v35 = vpop.xlane.xlu0 %822 }
 0x9c1   : > { %v824_v42 = vrot.slane %v823_v35, 4 }
 0x9c3   : > { %v825_v59 = vadd.f32 %v824_v42, %v823_v35 }
 0x9c5   : > { %v826_v6 = vrot.slane %v825_v59, 2 }
 0x9c7   : > { %v827_v36 = vadd.f32 %v826_v6, %v825_v59  ;;  %v909_v20 = vpop.xlane.xlu0 %908 }
 0x9c8   : > { %v910_v8 = vrot.slane %v909_v20, 4 }
 0x9c9   : > { %v828_v46 = vrot.slane %v827_v36, 1 }
 0x9ca   : > { %v911_v26 = vadd.f32 %v910_v8, %v909_v20 }
 0x9cb   : > { %v829_v2 = vadd.f32 %v828_v46, %v827_v36  ;;  %v4147_v37 = vpop.xlane.xlu0 %4146 }
 0x9cc   : > { %v4148_v63 = vrot.slane %v4147_v37, 4  ;;  %v912_v13 = vrot.slane %v911_v26, 2 }
 0x9cd   : > { %5050 = vpush %v829_v2 }
 0x9ce   : > { %v4149_v9 = vadd.f32 %v4148_v63, %v4147_v37  ;;  %v913_v16 = vadd.f32 %v912_v13, %v911_v26 }
 0x9d0   : > { %v914_v49 = vrot.slane %v913_v16, 1 }
 0x9d2   : > { %v915_v27 = vadd.f32 %v914_v49, %v913_v16 }
 0x9e9   : > { %v4122_v12 = vpop.f32.mrb[4].mxu0 }
 0x9ea   : > { %v4126_v40 = vsub.f32 %v6524_v48, %v4122_v12  ;;  %v4785_v29 = vpop.f32.mrb[5].mxu0  ;;  %v4150_v48 = vrot.slane %v4149_v9, 2 }
 0x9ec   : > { %v4193_v24 = vmul.f32 %v4126_v40, %v4126_v40  ;;  %v4179_v17 = vmul.f32 %v4177_v21, %v4126_v40  ;;  %v4151_v32 = vadd.f32 %v4150_v48, %v4149_v9 }
 0x9ee   : > { %v4194_v52 = vsel %vm4180_vm9, %v4193_v24, 0.0  ;;  %v4181_v15 = vsel %vm4180_vm9, %v4179_v17, 0.0  ;;  %v4152_v33 = vrot.slane %v4151_v32, 1 }
 0x9ef   : > { %4195 = vadd.xlane.f32.xlu0 %v4194_v52  ;;  %4182 = vadd.xlane.f32.xlu1 %v4181_v15 }
 0x9f0   : > { %v4153_v41 = vadd.f32 %v4152_v33, %v4151_v32 }
 0x9fe   : > { %s5051_s25 = spop %5050 }
 0x9ff   : > { %v4214_v46 = vstv %s5051_s25  ;;  %s5545_s25 = scalar_lea.vmem %s6808_s20, 128 }
 0xa00   : > { %v4215_v23 = vsel %vm4213_vm12, %v4214_v46, 0.0  ;;  %p5546_p6 = scmp.ne.s32.totalorder %s6808_s20, %s5545_s25 }
 0xa02   : > { %p5547_p5 = pnand %p5546_p6, %p6940_p11 }
 0xa04   : > { %p5548_p9 = pneg %p5547_p5 }
 0xa15   : > { %v840_v7 = vpop.xlane.xlu1 %839 }
 0xa16   : > { %v841_v18 = vrot.slane %v840_v7, 4 }
 0xa18   : > { %v842_v28 = vadd.f32 %v841_v18, %v840_v7 }
 0xa19   : > { %v934_v61 = vpop.xlane.xlu1 %933 }
 0xa1a   : > { %v843_v62 = vrot.slane %v842_v28, 2  ;;  %v935_v1 = vrot.slane %v934_v61, 4 }
 0xa1c   : > { %v936_v14 = vadd.f32 %v935_v1, %v934_v61  ;;  %v844_v4 = vadd.f32 %v843_v62, %v842_v28 }
 0xa1e   : > { %v937_v55 = vrot.slane %v936_v14, 2  ;;  %v845_v30 = vrot.slane %v844_v4, 1 }
 0xa20   : > { %v846_v53 = vadd.f32 %v845_v30, %v844_v4  ;;  %v938_v22 = vadd.f32 %v937_v55, %v936_v14 }
 0xa22   : > { %5052 = vpush %v846_v53  ;;  %v939_v60 = vrot.slane %v938_v22, 1 }
 0xa23   : > { %5054 = vpush %v915_v27 }
 0xa24   : > { %v940_v51 = vadd.f32 %v939_v60, %v938_v22 }
 0xa26   : > { %5056 = vpush %v940_v51 }
 0xa27   : > { %5058 = vpush %v4153_v41 }
 0xa53   : > { %s5053_s4 = spop %5052 }
 0xa54   : > { %s5055_s24 = spop %5054  ;;  %v4218_v56 = vstv %s5053_s4  ;;  %s5549_s4 = sshll.u32 %s5654_s21, 4  ;;  %s5550_s4 = int_to_ptr.vmem [resolvable:$false] %s5549_s4 }
 0xa55   : > { %v4207_v6 = vstv %s5055_s24  ;;  %v4219_v34 = vsel %vm4217_vm13, %v4218_v56, 0.0  ;;  %s5551_s24 = scalar_lea.vmem %s5550_s4, 256  ;;  %p5552_p13 = scmp.lt.s32.totalorder %s6808_s20, %s5550_s4 }
 0xa56   : > { %v4208_v2 = vsel %vm4206_vm11, %v4207_v6, 0.0  ;;  %p5553_p1 = scmp.lt.s32.totalorder %s5551_s24, %s5545_s25 }
 0xa57   : > { %s5057_s7 = spop %5056 }
 0xa58   : > { %v4210_v59 = vstv %s5057_s7  ;;  %s5059_s23 = spop %5058  ;;  %p5554_p7 = por %p5553_p1, %p5552_p13 }
 0xa59   : > { %v4211_v36 = vsel %vm4209_vm10, %v4210_v59, 0.0 }
 0xa5a   : > { %v4212_v57 = vadd.f32 %v4211_v36, %v4208_v2  ;;  %p5555_p12 = pnand %p5554_p7, %p5548_p9 }
 0xa5c   : > { %v4216_v3 = vadd.f32 %v4215_v23, %v4212_v57 }
 0xa5e   : > { %v4220_v25 = vadd.f32 %v4219_v34, %v4216_v3 }
 0xa7c   : > { %v4196_v38 = vpop.xlane.xlu0 %4195  ;;  %v4183_v44 = vpop.xlane.xlu1 %4182 }
 0xa7d   : > { %v4197_v43 = vrot.slane %v4196_v38, 4  ;;  %v4184_v11 = vrot.slane %v4183_v44, 4 }
 0xa7f   : > { %v4198_v0 = vadd.f32 %v4197_v43, %v4196_v38  ;;  %v4185_v10 = vadd.f32 %v4184_v11, %v4183_v44 }
 0xa81   : > { %v4199_v19 = vrot.slane %v4198_v0, 2  ;;  %v4186_v39 = vrot.slane %v4185_v10, 2 }
 0xa83   : > { %v4200_v58 = vadd.f32 %v4199_v19, %v4198_v0  ;;  %v4187_v54 = vadd.f32 %v4186_v39, %v4185_v10 }
 0xa85   : > { %v4188_v50 = vrot.slane %v4187_v54, 1  ;;  %v4201_v45 = vrot.slane %v4200_v58, 1 }
 0xa87   : > { %v4189_v35 = vadd.f32 %v4188_v50, %v4187_v54  ;;  %v4202_v42 = vadd.f32 %v4201_v45, %v4200_v58 }
 0xa89   : > { %5060 = vpush %v4189_v35 }
 0xa8a   : > { %5062 = vpush %v4202_v42 }
 0xaba   : > { %s5061_s22 = spop %5060 }
 0xabb   : > { %s4191_s29 = smul.f32 2.0, %s5061_s22  ;;  %s5063_s27 = spop %5062 }
 0xabc   : > { %s4204_s13 = smul.f32 256.0, %s5063_s27 }
 0xabd   : > { %s4192_s11 = sadd.f32 %s5059_s23, %s4191_s29 }
 0xabf   : > { %s4205_s19 = sadd.f32 %s4204_s13, %s4192_s11 }
 0xac1   : > { %v4222_v31 = vstv %s4205_s19 }
 0xac2   : > { %v4223_v47 = vsel %vm4221_vm14, %v4222_v31, 0.0 }
 0xac3   : > { %v4224_v12 = vadd.f32 %v4223_v47, %v4220_v25 }
 0xac5   : > { %4225 = vst [vmem:[%s573_s1] sm:$0xff] %v4224_v12 }
 0xac6   : > { %5558 = shalt.err (!%p5555_p12)
}
 0xac7   : > { %s5559_s12 = scalar_lea.hbm %s6806_s28, 128  ;;  %s5563_s26 = scalar_lea.hbm %s6939_s17, 256 }
 0xac8   : > { %p5560_p3 = scmp.ne.s32.totalorder %s6806_s28, %s5559_s12  ;;  %p5564_p8 = scmp.lt.u32.totalorder %s6806_s28, %s6939_s17 }
 0xac9   : > { %p5565_p10 = scmp.lt.u32.totalorder %s5563_s26, %s5559_s12  ;;  %p5567_p6 = scmp.lt.u32.totalorder %s5559_s12, %s6806_s28 }
 0xaca   : > { %p5561_p2 = pnand %p5560_p3, %p6940_p11 }
 0xacb   : > { %p5566_p4 = por %p5565_p10, %p5564_p8 }
 0xacc   : > { %p5562_p0 = pneg %p5561_p2 }
 0xacd   : > { %p5568_p5 = por %p5567_p6, %p5566_p4 }
 0xacf   : > { %p5569_p9 = pnand %p5568_p5, %p5562_p0 }
 0xad1   : > { %5572 = shalt.err (!%p5569_p9)
}
 0xad2   : > { %5096 = dma.vmem_to_hbm [thread:$0]  (%p6940_p11), %s6808_s20, 128, %s6806_s28, %s4227_s30  }
 0xad3 PF: > { %s6941_s27 = sld [smem:[#allocation28_spill]]  ;;  %s6942_s11 = sld [smem:[#allocation34_spill]] }
 0xad4   : > { %p6944_p1 = scmp.ge.s32.totalorder %s5635_s16, 2 }
 0xad9   : > { %s4252_s13 = sand.u32 1, %s6941_s27   ;;  %p6943_p13 = scmp.ne.s32.totalorder %s6942_s11, 0 }
 0xada   : > { %s4253_s19 = scalar_lea.sflag [#allocation4], %s4252_s13 }
 0xadb   : > { %p5131_p7 = pnand %p6944_p1, %p6943_p13 }
 0xadd   : > { %5618 = dma.done.wait (!%p5131_p7), %s4253_s19, 128  }
 0xade   : > { %5620 = vsyncadd (!%p5131_p7), %s4253_s19, 4294967168  ;;  %s6945_s16 = sld [smem:[#allocation31_spill]]  ;;  %s6946_s10 = sld [smem:[#allocation29_spill]] }
 0xadf   : > { %s6947_s15 = sld [smem:[#allocation32_spill]]  ;;  %s6948_s13 = smov %s5627_s14 }
 0xae4   : > { %p32_p12 = scmp.ge.s32.totalorder %s6945_s16, 4   ;;  %s6949_s14 = smov %s6946_s10 }
 0xae6   :  { %34 = sbr.rel (!%p32_p12) target bundleno = 18 (0x12), region = 166 }
 0xaed   :  { %4258 = vsyncpa [#allocation3], 1 }
 0xaee   :  { %4260 = vsyncpa [#allocation3 + $0x1], 1 }
 0xaef   :  { %4261 = vsyncpa [#allocation6], 1 }
 0xaf0   :  { %4263 = vsyncpa [#allocation6 + $0x1], 1 }
 0xaf1   :  { %4264 = vsyncpa [#allocation9], 1 }
 0xaf2   :  { %4266 = vsyncpa [#allocation9 + $0x1], 1 }
 0xaf3   :  { %4267 = vsyncpa [#allocation12], 1 }
 0xaf4   :  { %4268 = vsyncpa [#allocation15], 1 }
 0xaf5   :  { %4269 = vsyncpa [#allocation18], 1 }
 0xaf6   :  { %4270 = vsyncpa [#allocation4], 1 }
 0xaf7   :  { %4272 = vsyncpa [#allocation4 + $0x1], 1 }

</bundles_post_ra>
